<compile_context>
chip_gen: v5e
topology: v5e:2x2
jax: 0.10.0
libtpu: 0.0.40
codegen_flags: <defaults>
</compile_context>

<pallas_src>
import functools

import jax
import jax.numpy as jnp
from jax.experimental import pallas as pl
from jax.experimental.pallas import tpu as pltpu

_MASK_VALUE = -1e30  # large finite negative: exp() -> 0, never inf-inf NaNs


def _layer_norm(x, g, b, eps=1e-5):
    mu = jnp.mean(x, axis=-1, keepdims=True)
    var = jnp.mean((x - mu) ** 2, axis=-1, keepdims=True)
    return (x - mu) * jax.lax.rsqrt(var + eps) * g + b


def clip_layer_kernel(n_head, bblk, seq_len,
                      x_ref, mask_ref,
                      ln1_g_ref, ln1_b_ref,
                      wqkv_ref, bqkv_ref,
                      wo_ref, bo_ref,
                      ln2_g_ref, ln2_b_ref,
                      w1_ref, b1_ref,
                      w2_ref, b2_ref,
                      o_ref):
    Bb, S = bblk, seq_len
    E = x_ref.shape[-1]
    d_head = E // n_head
    M = Bb * S

    # Packed (Bb*S, E) slab: all per-token matmuls see M rows, not S.
    x = x_ref[...].astype(jnp.float32).reshape(M, E)

    # ---- residual 1 + LayerNorm 1 (fp32) --------------------------------
    residue = x
    h = _layer_norm(x, ln1_g_ref[...], ln1_b_ref[...])

    # ---- fused QKV projection: bf16 MXU inputs, fp32 accumulation -------
    qkv = jnp.dot(h.astype(jnp.bfloat16), wqkv_ref[...],
                  preferred_element_type=jnp.float32) + bqkv_ref[...]

    # Fold 1/sqrt(d_head) into q: cheap (M, E) VPU mul instead of (B*H,S,S).
    scale = 1.0 / jnp.sqrt(jnp.float32(d_head))
    q = qkv[:, :E] * scale
    k = qkv[:, E:2 * E]
    v = qkv[:, 2 * E:]

    # (M, E) -> (Bb*H, S, d_head): one batched attention over batch*heads.
    def to_heads(t):
        return (t.reshape(Bb, S, n_head, d_head)
                 .transpose(0, 2, 1, 3)
                 .reshape(Bb * n_head, S, d_head)
                 .astype(jnp.bfloat16))

    qh, kh, vh = to_heads(q), to_heads(k), to_heads(v)

    s = jnp.einsum("bqd,bkd->bqk", qh, kh,
                   preferred_element_type=jnp.float32)      # (Bb*H, S, S)
    s = s + mask_ref[...][None]                             # hoisted causal mask

    s = s - jnp.max(s, axis=-1, keepdims=True)              # fp32 softmax
    p = jnp.exp(s)
    p = p * pl.reciprocal(jnp.sum(p, axis=-1, keepdims=True), approx=True)

    attn = jnp.einsum("bqk,bkd->bqd", p.astype(jnp.bfloat16), vh,
                      preferred_element_type=jnp.float32)   # (Bb*H, S, d)
    attn = (attn.reshape(Bb, n_head, S, d_head)
                .transpose(0, 2, 1, 3)
                .reshape(M, E))
    attn = jnp.dot(attn.astype(jnp.bfloat16), wo_ref[...],
                   preferred_element_type=jnp.float32) + bo_ref[...]

    x1 = attn + residue

    # ---- residual 2 + LayerNorm 2 + MLP (quick GELU) --------------------
    residue2 = x1
    h2 = _layer_norm(x1, ln2_g_ref[...], ln2_b_ref[...])
    h2 = jnp.dot(h2.astype(jnp.bfloat16), w1_ref[...],
                 preferred_element_type=jnp.float32) + b1_ref[...]
    h2 = h2 * jax.nn.sigmoid(1.702 * h2)                    # quick GELU (EUP)
    h2 = jnp.dot(h2.astype(jnp.bfloat16), w2_ref[...],
                 preferred_element_type=jnp.float32) + b2_ref[...]

    o_ref[...] = (h2 + residue2).reshape(Bb, S, E).astype(o_ref.dtype)


PARAM_ORDER = ("ln1_g", "ln1_b", "wqkv", "bqkv", "wo", "bo",
               "ln2_g", "ln2_b", "w1", "b1", "w2", "b2")


def _vmem_capacity_bytes():
    """Per-core VMEM capacity; conservative v7x fallback if unqueryable."""
    try:
        return int(pltpu.get_tpu_info().vmem_capacity_bytes)
    except Exception:
        return 64 * 2 ** 20


def _block_footprint_bytes(bblk, S, E, H, param_bytes, in_itemsize, out_itemsize):
    """Rough per-grid-step VMEM footprint for a given batch-block size."""
    m = bblk * S
    io = 2 * m * E * (in_itemsize + out_itemsize)          # double-buffered x / out
    act = 4 * m * (3 * E                                   # x fp32 + residue + LN
                   + 3 * E                                 # fused qkv fp32
                   + E                                     # attn out fp32
                   + 2 * 4 * E)                            # MLP hidden fp32 (+gelu tmp)
    act += 2 * m * 3 * E                                   # bf16 per-head q/k/v copies
    act += 4 * 3 * bblk * H * S * S                        # scores / exp / probs fp32
    return param_bytes + io + act                          # params single-buffered


def _choose_block_batch(B, S, E, H, param_bytes, in_itemsize, out_itemsize,
                        vmem_cap, target_m=256):
    """Pick batch elements per grid step: fill MXU rows, fit VMEM, keep >=2 steps."""
    budget = int(0.7 * vmem_cap)
    fits = [d for d in range(1, B + 1) if B % d == 0 and
            _block_footprint_bytes(d, S, E, H, param_bytes,
                                   in_itemsize, out_itemsize) <= budget]
    if not fits:
        return 1
    pref = [d for d in fits if d * S >= target_m and B // d >= 2]
    if pref:
        return min(pref)
    pref = [d for d in fits if d * S >= target_m]
    if pref:
        return min(pref)
    pref = [d for d in fits if B // d >= 2]                 # keep both v7x TCs busy
    if pref:
        return max(pref)
    return max(fits)


def clip_layer(x, params, n_head, *, block_batch=None, out_dtype=None):
    B, S, E = x.shape
    out_dtype = jnp.dtype(out_dtype or x.dtype)
    param_list = [params[k] for k in PARAM_ORDER]
    param_bytes = sum(int(p.size) * p.dtype.itemsize for p in param_list)

    vmem_cap = _vmem_capacity_bytes()
    if block_batch is None:
        block_batch = _choose_block_batch(
            B, S, E, n_head, param_bytes,
            x.dtype.itemsize, out_dtype.itemsize, vmem_cap)
    assert B % block_batch == 0, (B, block_batch)
    grid = (B // block_batch,)

    # Hoisted additive causal mask (triu(1) -> large negative), fed once.
    row = jax.lax.broadcasted_iota(jnp.int32, (S, S), 0)
    col = jax.lax.broadcasted_iota(jnp.int32, (S, S), 1)
    mask = jnp.where(col > row, jnp.float32(_MASK_VALUE), jnp.float32(0.0))

    x_spec = pl.BlockSpec((block_batch, S, E), lambda b: (b, 0, 0))
    out_spec = pl.BlockSpec((block_batch, S, E), lambda b: (b, 0, 0))

    # Mask + parameters: full-array blocks, constant index map, Buffered(1)
    # => single-buffered, resident across the whole grid.
    const_specs = [
        pl.BlockSpec(p.shape, lambda b, nd=p.ndim: (0,) * nd,
                     pipeline_mode=pl.Buffered(1))
        for p in [mask] + param_list
    ]
    in_specs = [x_spec] + const_specs

    # ---- VMEM budget: real footprint + margin, capped at 85% of capacity --
    footprint = _block_footprint_bytes(block_batch, S, E, n_head, param_bytes,
                                       x.dtype.itemsize, out_dtype.itemsize)
    vmem_limit = int(min(int(0.85 * vmem_cap),
                         max(32 * 2 ** 20, footprint + 8 * 2 ** 20)))

    # ---- advisory cost estimate for XLA's scheduler ------------------------
    flops = B * (24 * S * E * E + 4 * S * S * E)
    transcendentals = B * (n_head * S * S + 4 * S * E)
    bytes_accessed = (int(x.size) * x.dtype.itemsize
                      + int(x.size) * out_dtype.itemsize
                      + param_bytes)

    kernel = functools.partial(clip_layer_kernel, n_head, block_batch, S)
    return pl.pallas_call(
        kernel,
        out_shape=jax.ShapeDtypeStruct((B, S, E), out_dtype),
        grid=grid,
        in_specs=in_specs,
        out_specs=out_spec,
        compiler_params=pltpu.CompilerParams(
            dimension_semantics=("parallel",),
            vmem_limit_bytes=vmem_limit),
        cost_estimate=pl.CostEstimate(
            flops=flops,
            transcendentals=transcendentals,
            bytes_accessed=bytes_accessed),
    )(x, mask, *param_list)


def ref_clip_layer(x, p, n_head):
    """Pure-JAX fp32 reference mirroring the PyTorch math (same weights)."""
    B, S, E = x.shape
    d_head = E // n_head
    hp = jax.lax.Precision.HIGHEST
    f32 = lambda a: a.astype(jnp.float32)

    def ln(v, g, b, eps=1e-5):
        mu = jnp.mean(v, axis=-1, keepdims=True)
        var = jnp.mean((v - mu) ** 2, axis=-1, keepdims=True)
        return (v - mu) / jnp.sqrt(var + eps) * g + b

    residue = x
    h = ln(x, p["ln1_g"], p["ln1_b"])
    qkv = jnp.dot(h, f32(p["wqkv"]), precision=hp) + p["bqkv"]
    q, k, v = jnp.split(qkv, 3, axis=-1)
    q = q.reshape(B, S, n_head, d_head).transpose(0, 2, 1, 3)
    k = k.reshape(B, S, n_head, d_head).transpose(0, 2, 1, 3)
    v = v.reshape(B, S, n_head, d_head).transpose(0, 2, 1, 3)
    w = jnp.einsum("bhqd,bhkd->bhqk", q, k, precision=hp)
    mask = jnp.triu(jnp.ones((S, S), dtype=bool), k=1)
    w = jnp.where(mask, -jnp.inf, w) / jnp.sqrt(jnp.float32(d_head))
    w = jax.nn.softmax(w, axis=-1)
    o = jnp.einsum("bhqk,bhkd->bhqd", w, v, precision=hp)
    o = o.transpose(0, 2, 1, 3).reshape(B, S, E)
    o = jnp.dot(o, f32(p["wo"]), precision=hp) + p["bo"]
    x1 = o + residue

    residue2 = x1
    h2 = ln(x1, p["ln2_g"], p["ln2_b"])
    h2 = jnp.dot(h2, f32(p["w1"]), precision=hp) + p["b1"]
    h2 = h2 * jax.nn.sigmoid(1.702 * h2)
    h2 = jnp.dot(h2, f32(p["w2"]), precision=hp) + p["b2"]
    return h2 + residue2


def make_params(key, n_embd):
    ks = jax.random.split(key, 8)
    E = n_embd
    f = jnp.float32
    bf = jnp.bfloat16  # weight matrices stored bf16 in HBM (MXU-native)
    return {
        "ln1_g": jnp.ones((1, E), f),
        "ln1_b": jnp.zeros((1, E), f),
        "wqkv":  (0.05 * jax.random.normal(ks[0], (E, 3 * E), f)).astype(bf),
        "bqkv":  0.01 * jax.random.normal(ks[1], (1, 3 * E), f),
        "wo":    (0.05 * jax.random.normal(ks[2], (E, E), f)).astype(bf),
        "bo":    0.01 * jax.random.normal(ks[3], (1, E), f),
        "ln2_g": jnp.ones((1, E), f),
        "ln2_b": jnp.zeros((1, E), f),
        "w1":    (0.05 * jax.random.normal(ks[4], (E, 4 * E), f)).astype(bf),
        "b1":    0.01 * jax.random.normal(ks[5], (1, 4 * E), f),
        "w2":    (0.05 * jax.random.normal(ks[6], (4 * E, E), f)).astype(bf),
        "b2":    0.01 * jax.random.normal(ks[7], (1, E), f),
    }


if __name__ == "__main__":
    # Small deterministic test; B=4 exercises batch packing (2 elems/step,
    # 2 grid steps), E a multiple of 128 keeps stores lane-dense.
    B, S, E, H = 4, 8, 128, 4
    key = jax.random.PRNGKey(0)
    kx, kp = jax.random.split(key)
    x = jax.random.normal(kx, (B, S, E), jnp.float32)
    params = make_params(kp, E)

    out = jax.block_until_ready(clip_layer(x, params, H))
    ref = jax.block_until_ready(ref_clip_layer(x, params, H))

    assert out.shape == (B, S, E)
    # Kernel uses bf16 MXU inputs (fp32 accumulation) + approx reciprocal vs.
    # an fp32 HIGHEST-precision reference, so allow bf16-level tolerance.
    max_err = float(jnp.max(jnp.abs(out - ref)))
    assert jnp.allclose(out, ref, rtol=2e-2, atol=2e-2), max_err

    print("KERNEL_OK")
</pallas_src>

<mosaic_0001>
module attributes {stable_mosaic.version = 11 : i64} {
  func.func @clip_layer_kernel(%arg0: i32, %arg1: memref<2x8x128xf32, #tpu.memory_space<vmem>>, %arg2: memref<8x8xf32, #tpu.memory_space<vmem>>, %arg3: memref<1x128xf32, #tpu.memory_space<vmem>>, %arg4: memref<1x128xf32, #tpu.memory_space<vmem>>, %arg5: memref<128x384xbf16, #tpu.memory_space<vmem>>, %arg6: memref<1x384xf32, #tpu.memory_space<vmem>>, %arg7: memref<128x128xbf16, #tpu.memory_space<vmem>>, %arg8: memref<1x128xf32, #tpu.memory_space<vmem>>, %arg9: memref<1x128xf32, #tpu.memory_space<vmem>>, %arg10: memref<1x128xf32, #tpu.memory_space<vmem>>, %arg11: memref<128x512xbf16, #tpu.memory_space<vmem>>, %arg12: memref<1x512xf32, #tpu.memory_space<vmem>>, %arg13: memref<512x128xbf16, #tpu.memory_space<vmem>>, %arg14: memref<1x128xf32, #tpu.memory_space<vmem>>, %arg15: memref<2x8x128xf32, #tpu.memory_space<vmem>>) attributes {dimension_semantics = [#tpu.dimension_semantics<parallel>], iteration_bounds = array<i64: 2>, scalar_prefetch = 0 : i64, scratch_operands = 0 : i64, tpu.core_type = #tpu.core_type<tc>, window_params = [{transform_indices = @transform_0, window_bounds = array<i64: 2, 8, 128>}, {pipeline_mode = #tpu.pipeline_mode<synchronous>, transform_indices = @transform_1, window_bounds = array<i64: 8, 8>}, {pipeline_mode = #tpu.pipeline_mode<synchronous>, transform_indices = @transform_2, window_bounds = array<i64: 1, 128>}, {pipeline_mode = #tpu.pipeline_mode<synchronous>, transform_indices = @transform_3, window_bounds = array<i64: 1, 128>}, {pipeline_mode = #tpu.pipeline_mode<synchronous>, transform_indices = @transform_4, window_bounds = array<i64: 128, 384>}, {pipeline_mode = #tpu.pipeline_mode<synchronous>, transform_indices = @transform_5, window_bounds = array<i64: 1, 384>}, {pipeline_mode = #tpu.pipeline_mode<synchronous>, transform_indices = @transform_6, window_bounds = array<i64: 128, 128>}, {pipeline_mode = #tpu.pipeline_mode<synchronous>, transform_indices = @transform_7, window_bounds = array<i64: 1, 128>}, {pipeline_mode = #tpu.pipeline_mode<synchronous>, transform_indices = @transform_8, window_bounds = array<i64: 1, 128>}, {pipeline_mode = #tpu.pipeline_mode<synchronous>, transform_indices = @transform_9, window_bounds = array<i64: 1, 128>}, {pipeline_mode = #tpu.pipeline_mode<synchronous>, transform_indices = @transform_10, window_bounds = array<i64: 128, 512>}, {pipeline_mode = #tpu.pipeline_mode<synchronous>, transform_indices = @transform_11, window_bounds = array<i64: 1, 512>}, {pipeline_mode = #tpu.pipeline_mode<synchronous>, transform_indices = @transform_12, window_bounds = array<i64: 512, 128>}, {pipeline_mode = #tpu.pipeline_mode<synchronous>, transform_indices = @transform_13, window_bounds = array<i64: 1, 128>}, {transform_indices = @transform_14, window_bounds = array<i64: 2, 8, 128>}]} {
    %c0 = arith.constant 0 : index
    %c0_0 = arith.constant 0 : index
    %c0_1 = arith.constant 0 : index
    %0 = vector.load %arg1[%c0, %c0_0, %c0_1] : memref<2x8x128xf32, #tpu.memory_space<vmem>>, vector<2x8x128xf32>
    %1 = vector.shape_cast %0 : vector<2x8x128xf32> to vector<16x128xf32>
    %c0_2 = arith.constant 0 : index
    %c0_3 = arith.constant 0 : index
    %2 = vector.load %arg3[%c0_2, %c0_3] : memref<1x128xf32, #tpu.memory_space<vmem>>, vector<1x128xf32>
    %c0_4 = arith.constant 0 : index
    %c0_5 = arith.constant 0 : index
    %3 = vector.load %arg4[%c0_4, %c0_5] : memref<1x128xf32, #tpu.memory_space<vmem>>, vector<1x128xf32>
    %cst = arith.constant dense<0.000000e+00> : vector<16xf32>
    %4 = vector.multi_reduction <add>, %1, %cst [1] : vector<16x128xf32> to vector<16xf32>
    %5 = vector.shape_cast %4 : vector<16xf32> to vector<16x1xf32>
    %cst_6 = arith.constant 1.280000e+02 : f32
    %6 = vector.broadcast %cst_6 : f32 to vector<16x1xf32>
    %7 = arith.divf %5, %6 : vector<16x1xf32>
    %8 = vector.broadcast %7 : vector<16x1xf32> to vector<16x128xf32>
    %9 = arith.subf %1, %8 : vector<16x128xf32>
    %10 = arith.mulf %9, %9 : vector<16x128xf32>
    %cst_7 = arith.constant dense<0.000000e+00> : vector<16xf32>
    %11 = vector.multi_reduction <add>, %10, %cst_7 [1] : vector<16x128xf32> to vector<16xf32>
    %12 = vector.shape_cast %11 : vector<16xf32> to vector<16x1xf32>
    %cst_8 = arith.constant 1.280000e+02 : f32
    %13 = vector.broadcast %cst_8 : f32 to vector<16x1xf32>
    %14 = arith.divf %12, %13 : vector<16x1xf32>
    %15 = vector.broadcast %7 : vector<16x1xf32> to vector<16x128xf32>
    %16 = arith.subf %1, %15 : vector<16x128xf32>
    %cst_9 = arith.constant 9.99999974E-6 : f32
    %17 = vector.broadcast %cst_9 : f32 to vector<16x1xf32>
    %18 = arith.addf %14, %17 : vector<16x1xf32>
    %19 = math.rsqrt %18 : vector<16x1xf32>
    %20 = vector.broadcast %19 : vector<16x1xf32> to vector<16x128xf32>
    %21 = arith.mulf %16, %20 : vector<16x128xf32>
    %22 = vector.broadcast %2 : vector<1x128xf32> to vector<16x128xf32>
    %23 = arith.mulf %21, %22 : vector<16x128xf32>
    %24 = vector.broadcast %3 : vector<1x128xf32> to vector<16x128xf32>
    %25 = arith.addf %23, %24 : vector<16x128xf32>
    %26 = arith.truncf %25 : vector<16x128xf32> to vector<16x128xbf16>
    %c0_10 = arith.constant 0 : index
    %c0_11 = arith.constant 0 : index
    %27 = vector.load %arg5[%c0_10, %c0_11] : memref<128x384xbf16, #tpu.memory_space<vmem>>, vector<128x384xbf16>
    %cst_12 = arith.constant dense<0.000000e+00> : vector<16x384xf32>
    %28 = tpu.matmul %26, %27, %cst_12 {dimension_numbers = #tpu.dot_dimension_numbers<[1], [0], [0], [1], [0, 0, 1, 1], [], []>} : vector<16x128xbf16>, vector<128x384xbf16>, vector<16x384xf32> -> vector<16x384xf32>
    %c0_13 = arith.constant 0 : index
    %c0_14 = arith.constant 0 : index
    %29 = vector.load %arg6[%c0_13, %c0_14] : memref<1x384xf32, #tpu.memory_space<vmem>>, vector<1x384xf32>
    %30 = vector.broadcast %29 : vector<1x384xf32> to vector<16x384xf32>
    %31 = arith.addf %28, %30 : vector<16x384xf32>
    %cst_15 = arith.constant 3.200000e+01 : f32
    %32 = math.sqrt %cst_15 : f32
    %cst_16 = arith.constant 1.000000e+00 : f32
    %33 = arith.divf %cst_16, %32 : f32
    %34 = vector.extract_strided_slice %31 {offsets = [0, 0], sizes = [16, 128], strides = [1, 1]} : vector<16x384xf32> to vector<16x128xf32>
    %35 = vector.broadcast %33 : f32 to vector<16x128xf32>
    %36 = arith.mulf %34, %35 : vector<16x128xf32>
    %37 = vector.extract_strided_slice %31 {offsets = [0, 128], sizes = [16, 128], strides = [1, 1]} : vector<16x384xf32> to vector<16x128xf32>
    %38 = vector.extract_strided_slice %31 {offsets = [0, 256], sizes = [16, 128], strides = [1, 1]} : vector<16x384xf32> to vector<16x128xf32>
    %39 = vector.shape_cast %36 : vector<16x128xf32> to vector<2x8x4x32xf32>
    %40 = tpu.transpose %39, [0, 2, 1, 3] : vector<2x8x4x32xf32> -> vector<2x4x8x32xf32>
    %41 = vector.shape_cast %40 : vector<2x4x8x32xf32> to vector<8x8x32xf32>
    %42 = arith.truncf %41 : vector<8x8x32xf32> to vector<8x8x32xbf16>
    %43 = vector.shape_cast %37 : vector<16x128xf32> to vector<2x8x4x32xf32>
    %44 = tpu.transpose %43, [0, 2, 1, 3] : vector<2x8x4x32xf32> -> vector<2x4x8x32xf32>
    %45 = vector.shape_cast %44 : vector<2x4x8x32xf32> to vector<8x8x32xf32>
    %46 = arith.truncf %45 : vector<8x8x32xf32> to vector<8x8x32xbf16>
    %47 = vector.shape_cast %38 : vector<16x128xf32> to vector<2x8x4x32xf32>
    %48 = tpu.transpose %47, [0, 2, 1, 3] : vector<2x8x4x32xf32> -> vector<2x4x8x32xf32>
    %49 = vector.shape_cast %48 : vector<2x4x8x32xf32> to vector<8x8x32xf32>
    %50 = arith.truncf %49 : vector<8x8x32xf32> to vector<8x8x32xbf16>
    "tpu.trace_start"() <{level = 10 : i32, message = "bqd,bkd->bqk"}> : () -> ()
    %cst_17 = arith.constant dense<0.000000e+00> : vector<8x8x8xf32>
    %51 = tpu.matmul %42, %46, %cst_17 {dimension_numbers = #tpu.dot_dimension_numbers<[2], [2], [1], [1], [0, 0, 0, 1, 1, 1], [0], [0]>} : vector<8x8x32xbf16>, vector<8x8x32xbf16>, vector<8x8x8xf32> -> vector<8x8x8xf32>
    "tpu.trace_stop"() : () -> ()
    %c0_18 = arith.constant 0 : index
    %c0_19 = arith.constant 0 : index
    %52 = vector.load %arg2[%c0_18, %c0_19] : memref<8x8xf32, #tpu.memory_space<vmem>>, vector<8x8xf32>
    %53 = vector.shape_cast %52 : vector<8x8xf32> to vector<1x8x8xf32>
    %54 = vector.broadcast %53 : vector<1x8x8xf32> to vector<8x8x8xf32>
    %55 = arith.addf %51, %54 : vector<8x8x8xf32>
    %cst_20 = arith.constant dense<0xFF800000> : vector<8x8xf32>
    %56 = vector.multi_reduction <maximumf>, %55, %cst_20 [2] : vector<8x8x8xf32> to vector<8x8xf32>
    %57 = vector.shape_cast %56 : vector<8x8xf32> to vector<8x8x1xf32>
    %58 = vector.broadcast %57 : vector<8x8x1xf32> to vector<8x8x8xf32>
    %59 = arith.subf %55, %58 : vector<8x8x8xf32>
    %60 = math.exp %59 : vector<8x8x8xf32>
    %cst_21 = arith.constant dense<0.000000e+00> : vector<8x8xf32>
    %61 = vector.multi_reduction <add>, %60, %cst_21 [2] : vector<8x8x8xf32> to vector<8x8xf32>
    %62 = vector.shape_cast %61 : vector<8x8xf32> to vector<8x8x1xf32>
    %63 = tpu.reciprocal %62 {approx = true} : vector<8x8x1xf32> -> vector<8x8x1xf32>
    %64 = vector.broadcast %63 : vector<8x8x1xf32> to vector<8x8x8xf32>
    %65 = arith.mulf %60, %64 : vector<8x8x8xf32>
    %66 = arith.truncf %65 : vector<8x8x8xf32> to vector<8x8x8xbf16>
    "tpu.trace_start"() <{level = 10 : i32, message = "bqk,bkd->bqd"}> : () -> ()
    %cst_22 = arith.constant dense<0.000000e+00> : vector<8x8x32xf32>
    %67 = tpu.matmul %66, %50, %cst_22 {dimension_numbers = #tpu.dot_dimension_numbers<[2], [1], [1], [2], [0, 0, 0, 1, 1, 2], [0], [0]>} : vector<8x8x8xbf16>, vector<8x8x32xbf16>, vector<8x8x32xf32> -> vector<8x8x32xf32>
    "tpu.trace_stop"() : () -> ()
    %68 = vector.shape_cast %67 : vector<8x8x32xf32> to vector<2x4x8x32xf32>
    %69 = tpu.transpose %68, [0, 2, 1, 3] : vector<2x4x8x32xf32> -> vector<2x8x4x32xf32>
    %70 = vector.shape_cast %69 : vector<2x8x4x32xf32> to vector<16x128xf32>
    %71 = arith.truncf %70 : vector<16x128xf32> to vector<16x128xbf16>
    %c0_23 = arith.constant 0 : index
    %c0_24 = arith.constant 0 : index
    %72 = vector.load %arg7[%c0_23, %c0_24] : memref<128x128xbf16, #tpu.memory_space<vmem>>, vector<128x128xbf16>
    %cst_25 = arith.constant dense<0.000000e+00> : vector<16x128xf32>
    %73 = tpu.matmul %71, %72, %cst_25 {dimension_numbers = #tpu.dot_dimension_numbers<[1], [0], [0], [1], [0, 0, 1, 1], [], []>} : vector<16x128xbf16>, vector<128x128xbf16>, vector<16x128xf32> -> vector<16x128xf32>
    %c0_26 = arith.constant 0 : index
    %c0_27 = arith.constant 0 : index
    %74 = vector.load %arg8[%c0_26, %c0_27] : memref<1x128xf32, #tpu.memory_space<vmem>>, vector<1x128xf32>
    %75 = vector.broadcast %74 : vector<1x128xf32> to vector<16x128xf32>
    %76 = arith.addf %73, %75 : vector<16x128xf32>
    %77 = arith.addf %76, %1 : vector<16x128xf32>
    %c0_28 = arith.constant 0 : index
    %c0_29 = arith.constant 0 : index
    %78 = vector.load %arg9[%c0_28, %c0_29] : memref<1x128xf32, #tpu.memory_space<vmem>>, vector<1x128xf32>
    %c0_30 = arith.constant 0 : index
    %c0_31 = arith.constant 0 : index
    %79 = vector.load %arg10[%c0_30, %c0_31] : memref<1x128xf32, #tpu.memory_space<vmem>>, vector<1x128xf32>
    %cst_32 = arith.constant dense<0.000000e+00> : vector<16xf32>
    %80 = vector.multi_reduction <add>, %77, %cst_32 [1] : vector<16x128xf32> to vector<16xf32>
    %81 = vector.shape_cast %80 : vector<16xf32> to vector<16x1xf32>
    %cst_33 = arith.constant 1.280000e+02 : f32
    %82 = vector.broadcast %cst_33 : f32 to vector<16x1xf32>
    %83 = arith.divf %81, %82 : vector<16x1xf32>
    %84 = vector.broadcast %83 : vector<16x1xf32> to vector<16x128xf32>
    %85 = arith.subf %77, %84 : vector<16x128xf32>
    %86 = arith.mulf %85, %85 : vector<16x128xf32>
    %cst_34 = arith.constant dense<0.000000e+00> : vector<16xf32>
    %87 = vector.multi_reduction <add>, %86, %cst_34 [1] : vector<16x128xf32> to vector<16xf32>
    %88 = vector.shape_cast %87 : vector<16xf32> to vector<16x1xf32>
    %cst_35 = arith.constant 1.280000e+02 : f32
    %89 = vector.broadcast %cst_35 : f32 to vector<16x1xf32>
    %90 = arith.divf %88, %89 : vector<16x1xf32>
    %91 = vector.broadcast %83 : vector<16x1xf32> to vector<16x128xf32>
    %92 = arith.subf %77, %91 : vector<16x128xf32>
    %cst_36 = arith.constant 9.99999974E-6 : f32
    %93 = vector.broadcast %cst_36 : f32 to vector<16x1xf32>
    %94 = arith.addf %90, %93 : vector<16x1xf32>
    %95 = math.rsqrt %94 : vector<16x1xf32>
    %96 = vector.broadcast %95 : vector<16x1xf32> to vector<16x128xf32>
    %97 = arith.mulf %92, %96 : vector<16x128xf32>
    %98 = vector.broadcast %78 : vector<1x128xf32> to vector<16x128xf32>
    %99 = arith.mulf %97, %98 : vector<16x128xf32>
    %100 = vector.broadcast %79 : vector<1x128xf32> to vector<16x128xf32>
    %101 = arith.addf %99, %100 : vector<16x128xf32>
    %102 = arith.truncf %101 : vector<16x128xf32> to vector<16x128xbf16>
    %c0_37 = arith.constant 0 : index
    %c0_38 = arith.constant 0 : index
    %103 = vector.load %arg11[%c0_37, %c0_38] : memref<128x512xbf16, #tpu.memory_space<vmem>>, vector<128x512xbf16>
    %cst_39 = arith.constant dense<0.000000e+00> : vector<16x512xf32>
    %104 = tpu.matmul %102, %103, %cst_39 {dimension_numbers = #tpu.dot_dimension_numbers<[1], [0], [0], [1], [0, 0, 1, 1], [], []>} : vector<16x128xbf16>, vector<128x512xbf16>, vector<16x512xf32> -> vector<16x512xf32>
    %c0_40 = arith.constant 0 : index
    %c0_41 = arith.constant 0 : index
    %105 = vector.load %arg12[%c0_40, %c0_41] : memref<1x512xf32, #tpu.memory_space<vmem>>, vector<1x512xf32>
    %106 = vector.broadcast %105 : vector<1x512xf32> to vector<16x512xf32>
    %107 = arith.addf %104, %106 : vector<16x512xf32>
    %cst_42 = arith.constant 1.702000e+00 : f32
    %108 = vector.broadcast %cst_42 : f32 to vector<16x512xf32>
    %109 = arith.mulf %108, %107 : vector<16x512xf32>
    %110 = arith.negf %109 : vector<16x512xf32>
    %111 = math.exp %110 : vector<16x512xf32>
    %cst_43 = arith.constant 1.000000e+00 : f32
    %112 = vector.broadcast %cst_43 : f32 to vector<16x512xf32>
    %113 = arith.addf %112, %111 : vector<16x512xf32>
    %114 = arith.divf %112, %113 : vector<16x512xf32>
    %115 = arith.mulf %107, %114 : vector<16x512xf32>
    %116 = arith.truncf %115 : vector<16x512xf32> to vector<16x512xbf16>
    %c0_44 = arith.constant 0 : index
    %c0_45 = arith.constant 0 : index
    %117 = vector.load %arg13[%c0_44, %c0_45] : memref<512x128xbf16, #tpu.memory_space<vmem>>, vector<512x128xbf16>
    %cst_46 = arith.constant dense<0.000000e+00> : vector<16x128xf32>
    %118 = tpu.matmul %116, %117, %cst_46 {dimension_numbers = #tpu.dot_dimension_numbers<[1], [0], [0], [1], [0, 0, 1, 1], [], []>} : vector<16x512xbf16>, vector<512x128xbf16>, vector<16x128xf32> -> vector<16x128xf32>
    %c0_47 = arith.constant 0 : index
    %c0_48 = arith.constant 0 : index
    %119 = vector.load %arg14[%c0_47, %c0_48] : memref<1x128xf32, #tpu.memory_space<vmem>>, vector<1x128xf32>
    %120 = vector.broadcast %119 : vector<1x128xf32> to vector<16x128xf32>
    %121 = arith.addf %118, %120 : vector<16x128xf32>
    %122 = arith.addf %121, %77 : vector<16x128xf32>
    %123 = vector.shape_cast %122 : vector<16x128xf32> to vector<2x8x128xf32>
    %c0_49 = arith.constant 0 : index
    %c0_50 = arith.constant 0 : index
    %c0_51 = arith.constant 0 : index
    %124 = vector.load %arg15[%c0_49, %c0_50, %c0_51] : memref<2x8x128xf32, #tpu.memory_space<vmem>>, vector<2x8x128xf32>
    tpu.vector_store %arg15[%c0_49, %c0_50, %c0_51], %123 {strides = array<i32>} : memref<2x8x128xf32, #tpu.memory_space<vmem>>, vector<2x8x128xf32>,
    return
  }
  func.func @transform_0(%arg0: i32) -> (i32, i32, i32) {
    %c0_i32 = arith.constant 0 : i32
    %c0_i32_0 = arith.constant 0 : i32
    %c0_i32_1 = arith.constant 0 : i32
    return %arg0, %c0_i32, %c0_i32_0 : i32, i32, i32
  }
  func.func @transform_1(%arg0: i32) -> (i32, i32) {
    %c0_i32 = arith.constant 0 : i32
    %c0_i32_0 = arith.constant 0 : i32
    %c0_i32_1 = arith.constant 0 : i32
    return %c0_i32, %c0_i32_0 : i32, i32
  }
  func.func @transform_2(%arg0: i32) -> (i32, i32) {
    %c0_i32 = arith.constant 0 : i32
    %c0_i32_0 = arith.constant 0 : i32
    %c0_i32_1 = arith.constant 0 : i32
    return %c0_i32, %c0_i32_0 : i32, i32
  }
  func.func @transform_3(%arg0: i32) -> (i32, i32) {
    %c0_i32 = arith.constant 0 : i32
    %c0_i32_0 = arith.constant 0 : i32
    %c0_i32_1 = arith.constant 0 : i32
    return %c0_i32, %c0_i32_0 : i32, i32
  }
  func.func @transform_4(%arg0: i32) -> (i32, i32) {
    %c0_i32 = arith.constant 0 : i32
    %c0_i32_0 = arith.constant 0 : i32
    %c0_i32_1 = arith.constant 0 : i32
    return %c0_i32, %c0_i32_0 : i32, i32
  }
  func.func @transform_5(%arg0: i32) -> (i32, i32) {
    %c0_i32 = arith.constant 0 : i32
    %c0_i32_0 = arith.constant 0 : i32
    %c0_i32_1 = arith.constant 0 : i32
    return %c0_i32, %c0_i32_0 : i32, i32
  }
  func.func @transform_6(%arg0: i32) -> (i32, i32) {
    %c0_i32 = arith.constant 0 : i32
    %c0_i32_0 = arith.constant 0 : i32
    %c0_i32_1 = arith.constant 0 : i32
    return %c0_i32, %c0_i32_0 : i32, i32
  }
  func.func @transform_7(%arg0: i32) -> (i32, i32) {
    %c0_i32 = arith.constant 0 : i32
    %c0_i32_0 = arith.constant 0 : i32
    %c0_i32_1 = arith.constant 0 : i32
    return %c0_i32, %c0_i32_0 : i32, i32
  }
  func.func @transform_8(%arg0: i32) -> (i32, i32) {
    %c0_i32 = arith.constant 0 : i32
    %c0_i32_0 = arith.constant 0 : i32
    %c0_i32_1 = arith.constant 0 : i32
    return %c0_i32, %c0_i32_0 : i32, i32
  }
  func.func @transform_9(%arg0: i32) -> (i32, i32) {
    %c0_i32 = arith.constant 0 : i32
    %c0_i32_0 = arith.constant 0 : i32
    %c0_i32_1 = arith.constant 0 : i32
    return %c0_i32, %c0_i32_0 : i32, i32
  }
  func.func @transform_10(%arg0: i32) -> (i32, i32) {
    %c0_i32 = arith.constant 0 : i32
    %c0_i32_0 = arith.constant 0 : i32
    %c0_i32_1 = arith.constant 0 : i32
    return %c0_i32, %c0_i32_0 : i32, i32
  }
  func.func @transform_11(%arg0: i32) -> (i32, i32) {
    %c0_i32 = arith.constant 0 : i32
    %c0_i32_0 = arith.constant 0 : i32
    %c0_i32_1 = arith.constant 0 : i32
    return %c0_i32, %c0_i32_0 : i32, i32
  }
  func.func @transform_12(%arg0: i32) -> (i32, i32) {
    %c0_i32 = arith.constant 0 : i32
    %c0_i32_0 = arith.constant 0 : i32
    %c0_i32_1 = arith.constant 0 : i32
    return %c0_i32, %c0_i32_0 : i32, i32
  }
  func.func @transform_13(%arg0: i32) -> (i32, i32) {
    %c0_i32 = arith.constant 0 : i32
    %c0_i32_0 = arith.constant 0 : i32
    %c0_i32_1 = arith.constant 0 : i32
    return %c0_i32, %c0_i32_0 : i32, i32
  }
  func.func @transform_14(%arg0: i32) -> (i32, i32, i32) {
    %c0_i32 = arith.constant 0 : i32
    %c0_i32_0 = arith.constant 0 : i32
    %c0_i32_1 = arith.constant 0 : i32
    return %arg0, %c0_i32, %c0_i32_0 : i32, i32, i32
  }
}

</mosaic_0001>

<bundles_post_ra>
// kernel: tpu_custom_call.1
= control target key start
LH: loop header
LB: loop body
LE: loop exit
PB: predicated region body
PF: predicated region fallthrough
CT: control target
= control target key end

     0   :  { %s5655_s0 = inlined_call_operand.hbm [shape: f32[4,8,128], index: 0, kind: input, shape index: {}]   ;;  %s5656_s1 = inlined_call_operand.hbm [shape: f32[8,8], index: 1, kind: input, shape index: {}]   ;;  %s5657_s2 = inlined_call_operand.hbm [shape: f32[1,128], index: 2, kind: input, shape index: {}]   ;;  %s5658_s3 = inlined_call_operand.hbm [shape: f32[1,128], index: 3, kind: input, shape index: {}]   ;;  %s5659_s4 = inlined_call_operand.hbm [shape: bf16[128,384], index: 4, kind: input, shape index: {}]   ;;  %s5660_s5 = inlined_call_operand.vmem [shape: f32[1,384], index: 5, kind: input, shape index: {}]   ;;  %s5661_s6 = inlined_call_operand.hbm [shape: bf16[128,128], index: 6, kind: input, shape index: {}]   ;;  %s5662_s7 = inlined_call_operand.hbm [shape: f32[1,128], index: 7, kind: input, shape index: {}]   ;;  %s5663_s8 = inlined_call_operand.hbm [shape: f32[1,128], index: 8, kind: input, shape index: {}]   ;;  %s5664_s9 = inlined_call_operand.vmem [shape: f32[1,128], index: 9, kind: input, shape index: {}]   ;;  %s5665_s10 = inlined_call_operand.hbm [shape: bf16[128,512], index: 10, kind: input, shape index: {}]   ;;  %s5666_s11 = inlined_call_operand.vmem [shape: f32[1,512], index: 11, kind: input, shape index: {}]   ;;  %s5667_s12 = inlined_call_operand.hbm [shape: bf16[512,128], index: 12, kind: input, shape index: {}]   ;;  %s5668_s13 = inlined_call_operand.vmem [shape: f32[1,128], index: 13, kind: input, shape index: {}]   ;;  %s5669_s14 = inlined_call_operand.hbm [shape: f32[4,8,128], index: 14, kind: output, shape index: {}]  }
   0x1   :  { %5672 = sst [smem:[#allocation27_spill]] %s5656_s1 }
   0x2   :  { %5673 = sst [smem:[#allocation28_spill]] %s5657_s2 }
   0x3   :  { %5674 = sst [smem:[#allocation29_spill]] %s5658_s3 }
   0x4   :  { %5675 = sst [smem:[#allocation30_spill]] %s5659_s4 }
   0x5   :  { %5676 = sst [smem:[#allocation31_spill]] %s5661_s6 }
   0x6   :  { %5677 = sst [smem:[#allocation32_spill]] %s5662_s7 }
   0x7   :  { %5678 = sst [smem:[#allocation33_spill]] %s5666_s11 }
   0x8   :  { %5679 = sst [smem:[#allocation34_spill]] %s5668_s13 }
   0x9   :  { %5680 = sst [smem:[#allocation35_spill]] %s5669_s14 }
   0xa   :  { %19 = vsyncpa [#allocation3], 0 }
   0xb   :  { %21 = vsyncpa [#allocation3 + $0x1], 0 }
   0xc   :  { %22 = vsyncpa [#allocation6], 0 }
   0xd   :  { %23 = vsyncpa [#allocation9], 0 }
   0xe   :  { %24 = vsyncpa [#allocation12], 0 }
   0xf   :  { %25 = vsyncpa [#allocation15], 0 }
  0x10   :  { %26 = vsyncpa [#allocation18], 0 }
  0x11   :  { %27 = vsyncpa [#allocation4], 0 }
  0x12   :  { %29 = vsyncpa [#allocation4 + $0x1], 0  ;;  %s4659_s29 = smov 0   ;;  %s4661_s30 = smov 0  }
  0x13   :  { %s4663_s15 = smov 0   ;;  %s4665_s16 = smov 0  }
  0x14 LB: > { %s5681_s1 = sld [smem:[#allocation27_spill]]  ;;  %s4683_s20 = sadd.s32 4294967295, %s4557_s16   ;;  %s4557_s16 = sphi %s4665_s16, %s5716_s16   ;;  %s4553_s15 = sphi %s4663_s15, %s5715_s15   ;;  %s4549_s30 = sphi %s4661_s30, %s5714_s30   ;;  %s4545_s29 = sphi %s4659_s29, %s5713_s29  }
  0x15   : > { %p3369_p0 = scmp.ge.s32.totalorder %s4557_s16, 1  ;;  %p56_p1 = scmp.eq.s32.totalorder %s4683_s20, 0 }
  0x16   : > { %p365_p2 = scmp.lt.s32.totalorder %s4557_s16, 3  ;;  %s4559_s22 = smov [#allocation5]  }
  0x17   : > { %s379_s23 = sshll.u32 %s4559_s22, 4  ;;  %s5683_s3 = sld [smem:[#allocation29_spill]]  ;;  %s380_s23 = int_to_ptr.vmem [resolvable:$true] %s379_s23 }
  0x18   : > { %p4688_p3 = pnand %p3369_p0, %p365_p2  ;;  %s4560_s28 = smov [#allocation8]  }
  0x19   : > { %s403_s17 = sshll.u32 %s4560_s28, 4  ;;  %s5685_s6 = sld [smem:[#allocation31_spill]]  ;;  %s404_s17 = int_to_ptr.vmem [resolvable:$true] %s403_s17 }
  0x1a   : > { %s377_s19 = sshll.u32 %s5681_s1, 4  ;;  %p3946_p5 = pneg %p4688_p3  ;;  %s378_s19 = int_to_ptr.hbm [resolvable:$true] %s377_s19 }
  0x1b   : > { %s4561_s24 = smov [#allocation11]   ;;  %s456_s13 = sshll.u32 %s5663_s8, 4  ;;  %s457_s13 = int_to_ptr.hbm [resolvable:$true] %s456_s13 }
  0x1c   : > { %p4700_p6 = pnand %p3946_p5, %p56_p1  ;;  %s431_s25 = sshll.u32 %s4561_s24, 4  ;;  %s432_s25 = int_to_ptr.vmem [resolvable:$true] %s431_s25 }
  0x1d   : > { %s401_s26 = sshll.u32 %s5683_s3, 4  ;;  %s5671_s28 = smov 64   ;;  %s402_s26 = int_to_ptr.hbm [resolvable:$true] %s401_s26 }
  0x1e   : > { %3949 = dma.hbm_to_vmem [thread:$0]  (!%p4700_p6), %s378_s19, 128, %s380_s23, [#allocation6]  }
  0x1f   : > { %s429_s1 = sshll.u32 %s5685_s6, 4  ;;  %s4563_s11 = smov 4   ;;  %s430_s1 = int_to_ptr.hbm [resolvable:$true] %s429_s1 }
  0x20   : > { %3955 = dma.hbm_to_vmem [thread:$0]  (!%p4700_p6), %s402_s26, 16, %s404_s17, [#allocation9]  }
  0x21   : > { %3961 = dma.hbm_to_vmem [thread:$0]  (!%p4700_p6), %s430_s1, 1024, %s432_s25, [#allocation12], %s5671_s28, %s5671_s28, %s4563_s11  }
  0x22   : > { %s4564_s18 = smov [#allocation14]   ;;  %s5686_s2 = sld [smem:[#allocation28_spill]] }
  0x23   : > { %s458_s19 = sshll.u32 %s4564_s18, 4  ;;  %s5687_s4 = sld [smem:[#allocation30_spill]]  ;;  %s459_s19 = int_to_ptr.vmem [resolvable:$true] %s458_s19 }
  0x24   : > { %3967 = dma.hbm_to_vmem [thread:$0]  (!%p4700_p6), %s457_s13, 16, %s459_s19, [#allocation15]  }
  0x25   : > { %s4565_s24 = smov [#allocation7]   ;;  %s4566_s1 = smov [#allocation10]  }
  0x26   : > { %s391_s6 = sshll.u32 %s4565_s24, 4  ;;  %s414_s25 = sshll.u32 %s4566_s1, 4  ;;  %s392_s6 = int_to_ptr.vmem [resolvable:$true] %s391_s6  ;;  %s415_s25 = int_to_ptr.vmem [resolvable:$true] %s414_s25 }
  0x27   : > { %s4567_s18 = smov 192   ;;  %s4568_s23 = smov 12  }
  0x28   : > { %s389_s17 = sshll.u32 %s5686_s2, 4  ;;  %s5688_s7 = sld [smem:[#allocation32_spill]]  ;;  %s390_s17 = int_to_ptr.hbm [resolvable:$true] %s389_s17 }
  0x29   : > { %s412_s22 = sshll.u32 %s5687_s4, 4  ;;  %s4569_s3 = smov [#allocation13]   ;;  %s413_s22 = int_to_ptr.hbm [resolvable:$true] %s412_s22 }
  0x2a   : > { %3952 = dma.hbm_to_vmem [thread:$0]  (!%p4700_p6), %s390_s17, 16, %s392_s6, [#allocation6]  }
  0x2b   : > { %3958 = dma.hbm_to_vmem [thread:$0]  (!%p4700_p6), %s413_s22, 3072, %s415_s25, [#allocation9], %s4567_s18, %s4567_s18, %s4568_s23  }
  0x2c   : > { %s446_s14 = sshll.u32 %s4569_s3, 4  ;;  %s470_s6 = sshll.u32 %s5665_s10, 4  ;;  %s447_s14 = int_to_ptr.vmem [resolvable:$true] %s446_s14  ;;  %s471_s6 = int_to_ptr.hbm [resolvable:$true] %s470_s6 }
  0x2d   : > { %s4570_s17 = smov [#allocation16]   ;;  %s4571_s1 = smov 256  }
  0x2e   : > { %s444_s26 = sshll.u32 %s5688_s7, 4  ;;  %s472_s22 = sshll.u32 %s4570_s17, 4  ;;  %s445_s26 = int_to_ptr.hbm [resolvable:$true] %s444_s26  ;;  %s473_s22 = int_to_ptr.vmem [resolvable:$true] %s472_s22 }
  0x2f   : > { %3964 = dma.hbm_to_vmem [thread:$0]  (!%p4700_p6), %s445_s26, 16, %s447_s14, [#allocation12]  }
  0x30   : > { %s4572_s25 = smov 16   ;;  %s487_s23 = sshll.u32 %s5667_s12, 4  ;;  %s488_s23 = int_to_ptr.hbm [resolvable:$true] %s487_s23 }
  0x31   : > { %3970 = dma.hbm_to_vmem [thread:$0]  (!%p4700_p6), %s471_s6, 4096, %s473_s22, [#allocation15], %s4571_s1, %s4571_s1, %s4572_s25  }
  0x32   : > { %s4573_s13 = smov [#allocation17]   ;;  %s5689_s26 = smov 64  }
  0x33   : > { %s489_s19 = sshll.u32 %s4573_s13, 4  ;;  %s3368_s3 = sadd.s32 4294967294, %s4557_s16   ;;  %s490_s19 = int_to_ptr.vmem [resolvable:$true] %s489_s19 }
  0x34   : > { %3973 = dma.hbm_to_vmem [thread:$0]  (!%p4700_p6), %s488_s23, 4096, %s490_s19, [#allocation18], %s5689_s26, %s5689_s26, %s4563_s11  }
  0x35   : > { %s4751_s14 = sadd.s32 1, %s4557_s16   ;;  %s42_s24 = sadd.s32 1, %s4553_s15 }
  0x36   : > { %s39_s6 = ssub.s32 %s4557_s16, %s4751_s14  ;;  %p49_p7 = scmp.ne.s32.totalorder %s4553_s15, %s4549_s30 }
  0x37   : > { %p40_p8 = scmp.eq.s32.totalorder %s39_s6, 0  ;;  %p50_p9 = scmp.eq.s32.totalorder %s4557_s16, 0 }
  0x38   : > { %p55_p10 = scmp.ne.s32.totalorder %s4549_s30, %s4545_s29  ;;  %p352_p11 = scmp.eq.s32.totalorder %s4683_s20, 1 }
  0x39   : > { %s4763_s17 = scalar_select %p40_p8, %s4553_s15, %s42_s24  }
  0x3a   : > { %p4765_p12 = por %p50_p9, %p49_p7  ;;  %p4771_p13 = por %p56_p1, %p55_p10 }
  0x3b   : > { %p4775_p0 = por %p352_p11, %p49_p7  ;;  %p358_p2 = scmp.eq.s32.totalorder %s3368_s3, 1 }
  0x3c   : > { %p3991_p5 = scmp.lt.s32.totalorder %s4557_s16, 2  ;;  %s506_s1 = sand.u32 1, %s4553_s15  }
  0x3d   : > { %p4781_p6 = por %p358_p2, %p55_p10  ;;  %s3380_s28 = sshll.u32 %s506_s1, 4 }
  0x3e   : > { %s3808_s18 = sshll.u32 %s4557_s16, 4  ;;  %s510_s24 = scalar_lea.vmem [#allocation2], %s3380_s28 }
  0x3f   : > { %s515_s19 = scalar_lea.hbm %s5655_s0, %s3808_s18  ;;  %s518_s6 = sshll.u32 %s510_s24, 4  ;;  %s519_s6 = int_to_ptr.vmem [resolvable:$true] %s518_s6 }
  0x40   : > { %s516_s26 = sshll.u32 %s515_s19, 4  ;;  %p4791_p7 = pnand %p3991_p5, %p4765_p12  ;;  %s517_s26 = int_to_ptr.hbm [resolvable:$true] %s516_s26 }
  0x41   : > { %s507_s2 = scalar_lea.sflag [#allocation3], %s506_s1  ;;  %s4441_s4 = sshra.s32 %s517_s26, 4  ;;  %s4442_s4 = int_to_ptr.hbm [resolvable:$true] %s4441_s4 }
  0x42   : > { %s4443_s7 = scalar_lea.hbm %s4442_s4, 16  ;;  %p4445_p9 = pneg %p4791_p7 }
  0x43   : > { %p4444_p8 = scmp.ne.s32.totalorder %s4442_s4, %s4443_s7  ;;  %s4448_s23 = scalar_lea.hbm %s5655_s0, 32 }
  0x44   : > { %p4449_p12 = scmp.lt.s32.totalorder %s4442_s4, %s5655_s0  ;;  %p4450_p2 = scmp.lt.s32.totalorder %s4448_s23, %s4443_s7 }
  0x45   : > { %p4446_p10 = pnand %p4445_p9, %p4444_p8 }
  0x46   : > { %p4451_p5 = por %p4450_p2, %p4449_p12 }
  0x47   : > { %p4447_p11 = pneg %p4446_p10 }
  0x49   : > { %p4452_p4 = pnand %p4451_p5, %p4447_p11 }
  0x4b   : > { %4455 = shalt.err (!%p4452_p4)
}
  0x4c   : > { %s4574_s1 = smov 128   ;;  %s4575_s19 = smov 8  }
  0x4d   : > { %3977 = dma.hbm_to_vmem [thread:$0]  (!%p4791_p7), %s517_s26, 256, %s519_s6, %s507_s2, %s4574_s1, %s4574_s1, %s4575_s19  }
  0x4e   : > { %530 = sbr.rel (%p4688_p3) target bundleno = 2130 (0x852), region = 76  ;;  %s4808_s24 = sand.u32 (!%p4688_p3), 1, %s4549_s30  }
  0x4f   : > { %s3384_s4 = sshll.u32 (!%p4688_p3), %s4808_s24, 4  ;;  %s533_s7 = scalar_lea.sflag (!%p4688_p3), [#allocation3], %s4808_s24 }
  0x50   : > { %s4814_s18 = scalar_lea.vmem (!%p4688_p3), [#allocation2], %s3384_s4 }
  0x53   : > { %4516 = dma.done.wait (%p4771_p13), %s533_s7, 256  }
  0x54   : > { %4518 = vsyncadd (%p4771_p13), %s533_s7, 4294967040 }
  0x55   : > { %4520 = dma.done.wait (%p56_p1), [#allocation6], 144  }
  0x56   : > { %4522 = vsyncadd (%p56_p1), [#allocation6], 4294967152 }
  0x57   : > { %4524 = dma.done.wait (%p56_p1), [#allocation9], 3088  }
  0x58   : > { %4526 = vsyncadd (%p56_p1), [#allocation9], 4294964208 }
  0x59   : > { %4528 = dma.done.wait (%p56_p1), [#allocation12], 1040  }
  0x5a   : > { %4530 = vsyncadd (%p56_p1), [#allocation12], 4294966256 }
  0x5b   : > { %4532 = dma.done.wait (%p56_p1), [#allocation15], 4112  }
  0x5c   : > { %4534 = vsyncadd (%p56_p1), [#allocation15], 4294963184 }
  0x5d   : > { %4536 = dma.done.wait (%p56_p1), [#allocation18], 4096  }
  0x5e   : > { %4538 = vsyncadd (%p56_p1), [#allocation18], 4294963200  ;;  %v630_v0 = vld [vmem:[%s4814_s18] sm:$0xff]  ;;  %v631_v1 = vld [vmem:[%s4814_s18 + $0x8] sm:$0xff]  ;;  %v4576_v2 = vmov 128.0   ;;  %s4577_s11 = smov 32  }
  0x5f   : > { %634 = vadd.xlane.f32.xlu0 %v630_v0  ;;  %4095 = vrcp.f32 %v4576_v2  ;;  %v3481_v17 = vld [vmem:[#allocation10 + $0xa8] sm:$0xf]  ;;  %v3831_v18 = vld [vmem:[#allocation10 + $0xb0] sm:$0xf0]  ;;  %v3830_v19 = vld [vmem:[#allocation10 + $0xac] sm:$0xf] }
  0x60   : > { %v3482_v20 = vor.u32 %v3831_v18, %v3481_v17  ;;  %v3483_v21 = vld [vmem:[#allocation10 + $0xb4] sm:$0xf0]  ;;  %v3489_v22 = vld [vmem:[#allocation10 + $0xb0] sm:$0xf]  ;;  %v3832_v23 = vld [vmem:[#allocation10 + $0xb8] sm:$0xf0] }
  0x61   : > { %v3486_v24 = vor.u32 %v3830_v19, %v3483_v21  ;;  %v3490_v25 = vor.u32 %v3832_v23, %v3489_v22  ;;  %v3469_v26 = vld [vmem:[#allocation10 + $0x90] sm:$0xf]  ;;  %v3828_v27 = vld [vmem:[#allocation10 + $0x98] sm:$0xf0]  ;;  %v3827_v28 = vld [vmem:[#allocation10 + $0x94] sm:$0xf] }
  0x62   : > { %860 = vmatpush.bf16.msra.mxu0 %v3482_v20  ;;  %v3470_v29 = vor.u32 %v3828_v27, %v3469_v26  ;;  %v3471_v30 = vld [vmem:[#allocation10 + $0x9c] sm:$0xf0]  ;;  %v3477_v31 = vld [vmem:[#allocation10 + $0x98] sm:$0xf]  ;;  %v3829_v32 = vld [vmem:[#allocation10 + $0xa0] sm:$0xf0] }
  0x63   : > { %874 = vmatpush.bf16.msra.mxu1 %v3486_v24  ;;  %888 = vmatpush.bf16.msra.mxu2 %v3490_v25  ;;  %v3474_v33 = vor.u32 %v3827_v28, %v3471_v30  ;;  %v3478_v34 = vor.u32 %v3829_v32, %v3477_v31  ;;  %v3457_v35 = vld [vmem:[#allocation10 + $0x78] sm:$0xf]  ;;  %v3825_v36 = vld [vmem:[#allocation10 + $0x80] sm:$0xf0]  ;;  %v3824_v37 = vld [vmem:[#allocation10 + $0x7c] sm:$0xf] }
  0x64   : > { %v3458_v38 = vor.u32 %v3825_v36, %v3457_v35  ;;  %v3459_v39 = vld [vmem:[#allocation10 + $0x84] sm:$0xf0]  ;;  %v3465_v40 = vld [vmem:[#allocation10 + $0x80] sm:$0xf]  ;;  %v3826_v41 = vld [vmem:[#allocation10 + $0x88] sm:$0xf0] }
  0x65   : > { %v4096_v3 = vpop.eup %4095  ;;  %v3462_v42 = vor.u32 %v3824_v37, %v3459_v39  ;;  %v3466_v43 = vor.u32 %v3826_v41, %v3465_v40  ;;  %v3445_v44 = vld [vmem:[#allocation10 + $0x60] sm:$0xf]  ;;  %v3822_v45 = vld [vmem:[#allocation10 + $0x68] sm:$0xf0]  ;;  %v3821_v46 = vld [vmem:[#allocation10 + $0x64] sm:$0xf] }
  0x66   : > { %v639_v4 = vmul.f32 128.0, %v4096_v3  ;;  %vm643_vm0 = vweird.f32 %v4096_v3  ;;  %861 = vmatpush.bf16.msra.mxu0 %v3470_v29  ;;  %v3446_v47 = vor.u32 %v3822_v45, %v3445_v44  ;;  %v3447_v48 = vld [vmem:[#allocation10 + $0x6c] sm:$0xf0]  ;;  %v3453_v49 = vld [vmem:[#allocation10 + $0x68] sm:$0xf]  ;;  %s4578_s26 = smov 96  }
  0x67   : > { %636 = vadd.xlane.f32.xlu0 %v631_v1  ;;  %875 = vmatpush.bf16.msra.mxu1 %v3474_v33  ;;  %v3823_v50 = vld [vmem:[#allocation10 + $0x70] sm:$0xf0]  ;;  %v3450_v51 = vor.u32 %v3821_v46, %v3447_v48  ;;  %v3433_v53 = vld [vmem:[#allocation10 + $0x48] sm:$0xf]  ;;  %v3818_v55 = vld [vmem:[#allocation10 + $0x4c] sm:$0xf] }
  0x68   : > { %v640_v5 = vsub.f32 1.0, %v639_v4  ;;  %889 = vmatpush.bf16.msra.mxu2 %v3478_v34  ;;  %v3454_v52 = vor.u32 %v3823_v50, %v3453_v49  ;;  %v3819_v54 = vld [vmem:[#allocation10 + $0x50] sm:$0xf0]  ;;  %v3435_v57 = vld [vmem:[#allocation10 + $0x54] sm:$0xf0]  ;;  %s4579_s6 = smov 64  }
  0x69   : > { %v3434_v56 = vor.u32 %v3819_v54, %v3433_v53  ;;  %v3441_v58 = vld [vmem:[#allocation10 + $0x50] sm:$0xf]  ;;  %v3820_v59 = vld [vmem:[#allocation10 + $0x58] sm:$0xf0]  ;;  %v3438_v60 = vor.u32 %v3818_v55, %v3435_v57  ;;  %v3423_v2 = vld [vmem:[#allocation10 + $0x3c] sm:$0xf0] }
  0x6a   : > { %v641_v6 = vmul.f32 %v4096_v3, %v640_v5  ;;  %862 = vmatpush.bf16.msra.mxu0 %v3458_v38  ;;  %v3442_v61 = vor.u32 %v3820_v59, %v3441_v58  ;;  %v3421_v62 = vld [vmem:[#allocation10 + $0x30] sm:$0xf]  ;;  %v3816_v63 = vld [vmem:[#allocation10 + $0x38] sm:$0xf0]  ;;  %v3817_v4 = vld [vmem:[#allocation10 + $0x40] sm:$0xf0] }
  0x6b   : > { %876 = vmatpush.bf16.msra.mxu1 %v3462_v42  ;;  %v3397_v19 = vld [vmem:[#allocation10] sm:$0xf]  ;;  %v3810_v20 = vld [vmem:[#allocation10 + $0x8] sm:$0xf0]  ;;  %v3809_v21 = vld [vmem:[#allocation10 + $0x4] sm:$0xf] }
  0x6c   : > { %v642_v7 = vadd.f32 %v4096_v3, %v641_v6  ;;  %890 = vmatpush.bf16.msra.mxu2 %v3466_v43  ;;  %v3398_v23 = vor.u32 %v3810_v20, %v3397_v19  ;;  %v3399_v24 = vld [vmem:[#allocation10 + $0xc] sm:$0xf0]  ;;  %v3405_v25 = vld [vmem:[#allocation10 + $0x8] sm:$0xf]  ;;  %v3811_v26 = vld [vmem:[#allocation10 + $0x10] sm:$0xf0] }
  0x6d   : > { %v3402_v28 = vor.u32 %v3809_v21, %v3399_v24  ;;  %v3406_v29 = vor.u32 %v3811_v26, %v3405_v25  ;;  %vm925_vm7 = vcmask 1047556   ;;  %v4581_v19 = vmov 1934713408   ;;  %s5695_s27 = sld [smem:[#allocation33_spill]]  ;;  %s626_s2 = scalar_lea.vmem [#allocation19], %s3384_s4 }
  0x6e   : > { %v4842_v8 = vsel %vm643_vm0, %v4096_v3, %v642_v7  ;;  %863 = vmatpush.bf16.msra.mxu0 %v3446_v47  ;;  %v3429_v3 = vld [vmem:[#allocation10 + $0x38] sm:$0xf]  ;;  %v4089_v47 = vld [vmem:[#allocation7] ss:$0 sm:$0xff]  ;;  %v954_v20 = vunpack.c.l.s4 %v4581_v19  ;;  %vm1650_vm8 = vcmask 261120   ;;  %vm1803_vm9 = vcmask 64512  }
  0x6f   : > { %877 = vmatpush.bf16.msra.mxu1 %v3450_v51  ;;  %v3430_v6 = vor.u32 %v3817_v4, %v3429_v3  ;;  %v3409_v7 = vld [vmem:[#allocation10 + $0x18] sm:$0xf]  ;;  %vm1903_vm10 = vcmask 1043456   ;;  %vm2299_vm11 = vcmask 523264   ;;  %vm2302_vm12 = vcmask 785408   ;;  %s5710_s7 = sld [smem:[#allocation34_spill]] }
  0x70   : > { %891 = vmatpush.bf16.msra.mxu2 %v3454_v52  ;;  %v4090_v52 = vld [vmem:[#allocation8] ss:$0 sm:$0xff]  ;;  %s3206_s3 = sshll.u32 %s626_s2, 4  ;;  %s3207_s3 = int_to_ptr.vmem [resolvable:$true] %s3206_s3 }
  0x72   : > { %864 = vmatpush.bf16.msra.mxu0 %v3434_v56 }
  0x73   : > { %878 = vmatpush.bf16.msra.mxu1 %v3438_v60 }
  0x74   : > { %892 = vmatpush.bf16.msra.mxu2 %v3442_v61 }
  0x78   : > { %893 = vmatpush.bf16.msra.mxu2 %v3430_v6  ;;  %v4580_v6 = vmov 1983009808  }
  0xd2   : > { %v635_v9 = vpop.xlane.xlu0 %634 }
  0xd3   : > { %v645_v10 = vmul.f32 %v4842_v8, %v635_v9  ;;  %v3813_v9 = vld [vmem:[#allocation10 + $0x20] sm:$0xf0] }
  0xd5   : > { %v4845_v11 = vsub.f32 %v630_v0, %v645_v10  ;;  %v3815_v0 = vld [vmem:[#allocation10 + $0x34] sm:$0xf]  ;;  %v3812_v10 = vld [vmem:[#allocation10 + $0x1c] sm:$0xf] }
  0xd6   : > { %v3426_v5 = vor.u32 %v3815_v0, %v3423_v2 }
  0xd7   : > { %v649_v12 = vmul.f32 %v4845_v11, %v4845_v11 }
  0xd8   : > { %879 = vmatpush.bf16.msra.mxu1 %v3426_v5 }
  0xd9   : > { %651 = vadd.xlane.f32.xlu1 %v649_v12  ;;  %v3410_v12 = vor.u32 %v3813_v9, %v3409_v7  ;;  %v930_v7 = vunpack.c.l.s4 %v4580_v6 }
  0xda   : > { %v637_v13 = vpop.xlane.xlu0 %636 }
  0xdb   : > { %v646_v14 = vmul.f32 %v4842_v8, %v637_v13  ;;  %v3411_v13 = vld [vmem:[#allocation10 + $0x24] sm:$0xf0] }
  0xdc   : > { %v3414_v17 = vor.u32 %v3812_v10, %v3411_v13  ;;  %v4887_v13 = vunpack.c.0.s8 %v930_v7 }
  0xdd   : > { %v4850_v15 = vsub.f32 %v631_v1, %v646_v14  ;;  %v3422_v1 = vor.u32 %v3816_v63, %v3421_v62  ;;  %v3417_v14 = vld [vmem:[#allocation10 + $0x20] sm:$0xf] }
  0xde   : > { %880 = vmatpush.bf16.msra.mxu1 %v3414_v17 }
  0xdf   : > { %v650_v16 = vmul.f32 %v4850_v15, %v4850_v15  ;;  %865 = vmatpush.bf16.msra.mxu0 %v3422_v1 }
  0xe1   : > { %653 = vadd.xlane.f32.xlu1 %v650_v16  ;;  %v3814_v16 = vld [vmem:[#allocation10 + $0x28] sm:$0xf0] }
  0xe2   : > { %v3418_v18 = vor.u32 %v3814_v16, %v3417_v14  ;;  %881 = vmatpush.bf16.msra.mxu1 %v3402_v28 }
  0xe3   : > { %866 = vmatpush.bf16.msra.mxu0 %v3410_v12 }
  0xe4   : > { %894 = vmatpush.bf16.msra.mxu2 %v3418_v18 }
  0xe7   : > { %867 = vmatpush.bf16.msra.mxu0 %v3398_v23 }
  0xe8   : > { %895 = vmatpush.bf16.msra.mxu2 %v3406_v29 }
 0x14c   : > { %v652_v22 = vpop.xlane.xlu1 %651 }
 0x14d   : > { %v655_v27 = vmul.f32 %v652_v22, %v4842_v8 }
 0x14f   : > { %v657_v30 = vadd.f32 1e-05, %v655_v27  ;;  %v4896_v27 = vunpack.c.0.s8 %v954_v20 }
 0x151   : > { %4097 = vrsqrt.f32 %v657_v30  ;;  %vm665_vm2 = vweird.f32 %v657_v30 }
 0x154   : > { %v654_v31 = vpop.xlane.xlu1 %653 }
 0x155   : > { %v656_v32 = vmul.f32 %v654_v31, %v4842_v8 }
 0x157   : > { %v4098_v33 = vpop.eup %4097  ;;  %v658_v34 = vadd.f32 1e-05, %v656_v32 }
 0x158   : > { %v660_v35 = vmul.f32 %v4098_v33, %v657_v30  ;;  %vm666_vm1 = vweird.f32 %v4098_v33 }
 0x159   : > { %4099 = vrsqrt.f32 %v658_v34  ;;  %vm667_vm3 = vmor %vm665_vm2, %vm666_vm1  ;;  %vm675_vm5 = vweird.f32 %v658_v34 }
 0x15a   : > { %v661_v36 = vmul.f32 %v4098_v33, %v660_v35 }
 0x15c   : > { %v662_v37 = vmul.f32 0.5, %v661_v36 }
 0x15e   : > { %v663_v38 = vsub.f32 1.5, %v662_v37 }
 0x15f   : > { %v4100_v39 = vpop.eup %4099 }
 0x160   : > { %v664_v40 = vmul.f32 %v4098_v33, %v663_v38  ;;  %v670_v41 = vmul.f32 %v4100_v39, %v658_v34  ;;  %vm676_vm4 = vweird.f32 %v4100_v39 }
 0x161   : > { %vm677_vm6 = vmor %vm675_vm5, %vm676_vm4 }
 0x162   : > { %v671_v42 = vmul.f32 %v4100_v39, %v670_v41  ;;  %v668_v43 = vsel %vm667_vm3, %v4098_v33, %v664_v40 }
 0x163   : > { %v679_v46 = vmul.f32 %v668_v43, %v4845_v11  ;;  %v4861_v11 = vld [vmem:[%s5660_s5] sm:$0x7] }
 0x164   : > { %v672_v44 = vmul.f32 0.5, %v671_v42  ;;  %v726_v57 = vperm.slane %v4861_v11, 0  ;;  %v727_v58 = vperm.slane %v4861_v11, 1 }
 0x165   : > { %v684_v51 = vmul.f32 %v4089_v47, %v679_v46 }
 0x166   : > { %v673_v45 = vsub.f32 1.5, %v672_v44 }
 0x167   : > { %v689_v54 = vadd.f32 %v4090_v52, %v684_v51 }
 0x168   : > { %v674_v48 = vmul.f32 %v4100_v39, %v673_v45 }
 0x16a   : > { %v678_v49 = vsel %vm677_vm6, %v4100_v39, %v674_v48 }
 0x16b   : > { %v680_v50 = vmul.f32 %v678_v49, %v4850_v15 }
 0x16d   : > { %v685_v53 = vmul.f32 %v4089_v47, %v680_v50 }
 0x16f   : > { %v690_v55 = vadd.f32 %v4090_v52, %v685_v53 }
 0x171   : > { %v691_v56 = vpack.c.bf16 %v690_v55, %v689_v54 }
 0x173   : > { %868 = vmatmul.bf16.vlgmr.msra.gmra.mxu0 %v691_v56  ;;  %882 = vmatmul.bf16.vlgmr.msra.gmra.mxu1 %v691_v56 }
 0x174   : > { %896 = vmatmul.bf16.vlgmr.msra.gmra.mxu2 %v691_v56 }
 0x1f0   : > { %v869_v59 = vpop.f32.mrf.mxu0  ;;  %v883_v15 = vpop.f32.mrf.mxu1 }
 0x1f1   : > { %v870_v60 = vadd.f32 %v869_v59, %v726_v57  ;;  %v884_v61 = vadd.f32 %v883_v15, %v727_v58 }
 0x1f3   : > { %v902_v62 = vmul.f32 0.17677669, %v870_v60  ;;  %1167 = vrot.lane.b32.xlu0 %v884_v61, %s4577_s11  ;;  %1155 = vrot.lane.b32.xlu2 %v884_v61, %s4578_s26  ;;  %v1175_v12 = vrot.slane %v884_v61, 4 }
 0x1f5   : > { %906 = vrot.lane.b32.xlu1 %v902_v62, %s4578_s26  ;;  %v927_v17 = vrot.slane %v902_v62, 4 }
 0x1f8   : > { %v871_v63 = vpop.f32.mrf.mxu0  ;;  %v885_v0 = vpop.f32.mrf.mxu1 }
 0x1f9   : > { %v872_v1 = vadd.f32 %v871_v63, %v726_v57  ;;  %v4868_v2 = vadd.f32 %v885_v0, %v727_v58 }
 0x1fb   : > { %v4870_v3 = vmul.f32 0.17677669, %v872_v1  ;;  %1163 = vrot.lane.b32.xlu0 %v4868_v2, %s4579_s6  ;;  %1161 = vrot.lane.b32.xlu2 %v884_v61, %s4579_s6  ;;  %v1231_v7 = vrot.slane %v4868_v2, 4 }
 0x1fd   : > { %908 = vrot.lane.b32.xlu1 %v4870_v3, %s4578_s26 }
 0x203   : > { %914 = vrot.lane.b32.xlu0 %v4870_v3, %s4579_s6  ;;  %912 = vrot.lane.b32.xlu2 %v902_v62, %s4579_s6 }
 0x20b   : > { %918 = vrot.lane.b32.xlu2 %v902_v62, %s4577_s11 }
 0x213   : > { %1157 = vrot.lane.b32.xlu2 %v4868_v2, %s4578_s26 }
 0x21b   : > { %1169 = vrot.lane.b32.xlu2 %v4868_v2, %s4577_s11 }
 0x223   : > { %920 = vrot.lane.b32.xlu2 %v4870_v3, %s4577_s11 }
 0x24d   : > { %v1156_v4 = vpop.permute.xlu2 %1155 }
 0x24e   : > { %v1187_v24 = vrot.slane %v1156_v4, 4 }
 0x255   : > { %v1162_v5 = vpop.permute.xlu2 %1161 }
 0x256   : > { %v1173_v9 = vrot.slane %v1162_v5, 4  ;;  %v1176_v16 = vsel %vm925_vm7, %v1162_v5, %v1175_v12 }
 0x257   : > { %v1184_v22 = vperm.slane %v1176_v16, %v4887_v13 }
 0x258   : > { %v1174_v18 = vsel %vm925_vm7, %v1173_v9, %v884_v61  ;;  %v983_v9 = vrot.slane %v4870_v3, 4 }
 0x259   : > { %v1180_v25 = vperm.slane %v1174_v18, %v4887_v13  ;;  %v1211_v34 = vrot.slane %v1184_v22, 4 }
 0x25b   : > { %v1199_v37 = vrot.slane %v1180_v25, 4 }
 0x25d   : > { %v913_v10 = vpop.permute.xlu2 %912 }
 0x25e   : > { %v924_v14 = vrot.slane %v913_v10, 4  ;;  %v928_v21 = vsel %vm925_vm7, %v913_v10, %v927_v17 }
 0x25f   : > { %v936_v26 = vperm.slane %v928_v21, %v4887_v13 }
 0x260   : > { %v926_v23 = vsel %vm925_vm7, %v924_v14, %v902_v62 }
 0x261   : > { %v932_v30 = vperm.slane %v926_v23, %v4887_v13  ;;  %v963_v46 = vrot.slane %v936_v26, 4 }
 0x263   : > { %v951_v45 = vrot.slane %v932_v30, 4 }
 0x265   : > { %v1168_v28 = vpop.permute.xlu0 %1167  ;;  %v919_v29 = vpop.permute.xlu2 %918 }
 0x266   : > { %v1185_v31 = vrot.slane %v1168_v28, 4  ;;  %v1188_v32 = vsel %vm925_vm7, %v1168_v28, %v1187_v24  ;;  %v937_v33 = vrot.slane %v919_v29, 4 }
 0x267   : > { %v1196_v35 = vperm.slane %v1188_v32, %v4887_v13  ;;  %v907_v36 = vpop.permute.xlu1 %906 }
 0x268   : > { %v1186_v38 = vsel %vm925_vm7, %v1185_v31, %v1156_v4  ;;  %v938_v39 = vsel %vm925_vm7, %v937_v33, %v907_v36  ;;  %v939_v40 = vrot.slane %v907_v36, 4 }
 0x269   : > { %v1192_v41 = vperm.slane %v1186_v38, %v4887_v13  ;;  %v1209_v42 = vrot.slane %v1196_v35, 4  ;;  %v1212_v43 = vsel %vm925_vm7, %v1196_v35, %v1211_v34  ;;  %v944_v44 = vperm.slane %v938_v39, %v4887_v13 }
 0x26a   : > { %v1220_v47 = vperm.slane %v1212_v43, %v4896_v27  ;;  %v940_v48 = vsel %vm925_vm7, %v919_v29, %v939_v40 }
 0x26b   : > { %v1197_v49 = vrot.slane %v1192_v41, 4  ;;  %v1200_v50 = vsel %vm925_vm7, %v1192_v41, %v1199_v37  ;;  %v1210_v51 = vsel %vm925_vm7, %v1209_v42, %v1184_v22  ;;  %v948_v52 = vperm.slane %v940_v48, %v4887_v13 }
 0x26c   : > { %v1208_v53 = vperm.slane %v1200_v50, %v4896_v27  ;;  %v1216_v54 = vperm.slane %v1210_v51, %v4896_v27  ;;  %v1227_v55 = vrot.slane %v1220_v47, 4  ;;  %v949_v56 = vrot.slane %v944_v44, 4 }
 0x26d   : > { %v1198_v57 = vsel %vm925_vm7, %v1197_v49, %v1180_v25  ;;  %v952_v58 = vsel %vm925_vm7, %v944_v44, %v951_v45  ;;  %v961_v59 = vrot.slane %v948_v52, 4  ;;  %v1164_v15 = vpop.permute.xlu0 %1163  ;;  %v1158_v60 = vpop.permute.xlu2 %1157  ;;  %v964_v0 = vsel %vm925_vm7, %v948_v52, %v963_v46 }
 0x26e   : > { %v4915_v61 = vrot.slane %v1208_v53, 4  ;;  %v1225_v62 = vrot.slane %v1216_v54, 4  ;;  %v1228_v63 = vsel %vm925_vm7, 0.0, %v1227_v55  ;;  %v950_v1 = vsel %vm925_vm7, %v949_v56, %v932_v30 }
 0x26f   : > { %v960_v4 = vperm.slane %v952_v58, %v4896_v27  ;;  %v1204_v5 = vperm.slane %v1198_v57, %v4896_v27  ;;  %v956_v6 = vperm.slane %v950_v1, %v4896_v27  ;;  %v1301_v12 = vrot.slane %v1228_v63, 4  ;;  %v909_v25 = vpop.permute.xlu1 %908 }
 0x270   : > { %v1224_v10 = vsel %vm925_vm7, 0.0, %v4915_v61  ;;  %v962_v14 = vsel %vm925_vm7, %v961_v59, %v936_v26  ;;  %v972_v16 = vperm.slane %v964_v0, %v4896_v27  ;;  %v1226_v17 = vsel %vm925_vm7, 0.0, %v1225_v62 }
 0x271   : > { %v4931_v18 = vperm.slane %v962_v14, %v4896_v27  ;;  %v975_v19 = vrot.slane %v960_v4, 4  ;;  %v1229_v20 = vrot.slane %v1164_v15, 4  ;;  %v4934_v21 = vsel %vm925_vm7, %v1227_v55, %v1216_v54 }
 0x272   : > { %v973_v22 = vrot.slane %v956_v6, 4  ;;  %v4936_v23 = vrot.slane %v972_v16, 4  ;;  %v1232_v24 = vsel %vm925_vm7, %v1164_v15, %v1231_v7  ;;  %v1221_v28 = vrot.slane %v1204_v5, 4 }
 0x273   : > { %v1290_v26 = vrot.slane %v1224_v10, 4  ;;  %v976_v29 = vsel %vm925_vm7, 0.0, %v975_v19  ;;  %v977_v30 = vrot.slane %v4931_v18, 4  ;;  %v1302_v31 = vsel %vm925_vm7, %v1301_v12, %v1226_v17 }
 0x274   : > { %v4944_v32 = vsel %vm925_vm7, 0.0, %v4936_v23  ;;  %v1230_v33 = vsel %vm925_vm7, %v1229_v20, %v4868_v2  ;;  %v1240_v34 = vperm.slane %v1232_v24, %v4887_v13  ;;  %v1243_v38 = vrot.slane %v1158_v60, 4 }
 0x275   : > { %v915_v35 = vpop.permute.xlu0 %914  ;;  %v1170_v36 = vpop.permute.xlu2 %1169  ;;  %v1236_v37 = vperm.slane %v1230_v33, %v4887_v13  ;;  %v995_v39 = vrot.slane %v909_v25, 4  ;;  %v974_v41 = vsel %vm925_vm7, 0.0, %v973_v22  ;;  %v4952_v42 = vsel %vm925_vm7, %v975_v19, %v956_v6 }
 0x276   : > { %v981_v40 = vrot.slane %v915_v35, 4  ;;  %v1042_v43 = vrot.slane %v976_v29, 4  ;;  %v1241_v44 = vrot.slane %v1170_v36, 4  ;;  %v4955_v45 = vsel %vm925_vm7, 0.0, %v977_v30 }
 0x277   : > { %v1053_v2 = vrot.slane %v4944_v32, 4  ;;  %v984_v46 = vsel %vm925_vm7, %v915_v35, %v983_v9  ;;  %v1244_v47 = vsel %vm925_vm7, %v1170_v36, %v1243_v38  ;;  %v1267_v48 = vrot.slane %v1240_v34, 4 }
 0x278   : > { %v1242_v49 = vsel %vm925_vm7, %v1241_v44, %v1158_v60  ;;  %v1252_v50 = vperm.slane %v1244_v47, %v4887_v13  ;;  %v1222_v51 = vsel %vm925_vm7, 0.0, %v1221_v28  ;;  %v1255_v52 = vrot.slane %v1236_v37, 4 }
 0x279   : > { %v982_v53 = vsel %vm925_vm7, %v981_v40, %v4870_v3  ;;  %v1248_v54 = vperm.slane %v1242_v49, %v4887_v13  ;;  %v1291_v55 = vsel %vm925_vm7, %v1290_v26, %v1222_v51  ;;  %v4968_v56 = vsel %vm925_vm7, %v1042_v43, %v974_v41 }
 0x27a   : > { %v992_v57 = vperm.slane %v984_v46, %v4887_v13  ;;  %v1265_v58 = vrot.slane %v1252_v50, 4  ;;  %v1268_v59 = vsel %vm925_vm7, %v1252_v50, %v1267_v48  ;;  %v1295_v63 = vperm.slane %v1291_v55, %v4887_v13 }
 0x27b   : > { %v1253_v15 = vrot.slane %v1248_v54, 4  ;;  %v1256_v60 = vsel %vm925_vm7, %v1248_v54, %v1255_v52  ;;  %v1276_v62 = vperm.slane %v1268_v59, %v4896_v27  ;;  %v988_v3 = vperm.slane %v982_v53, %v4887_v13 }
 0x27c   : > { %v1264_v0 = vperm.slane %v1256_v60, %v4896_v27  ;;  %v1266_v1 = vsel %vm925_vm7, %v1265_v58, %v1240_v34  ;;  %v1285_v6 = vsel %vm925_vm7, %v4915_v61, %v1204_v5  ;;  %v1306_v17 = vperm.slane %v1302_v31, %v4887_v13 }
 0x27d   : > { %v921_v4 = vpop.permute.xlu2 %920  ;;  %v1254_v7 = vsel %vm925_vm7, %v1253_v15, %v1236_v37  ;;  %v1272_v9 = vperm.slane %v1266_v1, %v4896_v27  ;;  %v1283_v10 = vrot.slane %v1276_v62, 4  ;;  %v1307_v19 = vrot.slane %v1295_v63, 4 }
 0x27e   : > { %v993_v12 = vrot.slane %v921_v4, 4  ;;  %v4982_v14 = vrot.slane %v1264_v0, 4  ;;  %v996_v16 = vsel %vm925_vm7, %v921_v4, %v995_v39  ;;  %v1289_v61 = vperm.slane %v1285_v6, %v4887_v13 }
 0x27f   : > { %v1281_v20 = vrot.slane %v1272_v9, 4  ;;  %v1284_v22 = vsel %vm925_vm7, 0.0, %v1283_v10  ;;  %v1007_v5 = vrot.slane %v988_v3, 4  ;;  %v1019_v28 = vrot.slane %v992_v57, 4 }
 0x280   : > { %v994_v24 = vsel %vm925_vm7, %v993_v12, %v909_v25  ;;  %v4990_v26 = vperm.slane %v1254_v7, %v4896_v27  ;;  %v1300_v29 = vperm.slane %v4934_v21, %v4887_v13  ;;  %v4996_v30 = vsel %vm925_vm7, 0.0, %v4982_v14 }
 0x281   : > { %v1350_v31 = vsel %vm925_vm7, %v1283_v10, %v1272_v9  ;;  %v1000_v33 = vperm.slane %v994_v24, %v4887_v13  ;;  %v1004_v25 = vperm.slane %v996_v16, %v4887_v13  ;;  %v1282_v34 = vsel %vm925_vm7, 0.0, %v1281_v20 }
 0x282   : > { %v1355_v35 = vrot.slane %v1284_v22, 4  ;;  %v1308_v36 = vsel %vm925_vm7, %v1307_v19, %v1289_v61  ;;  %v1319_v37 = vrot.slane %v1306_v17, 4  ;;  %v1309_v40 = vrot.slane %v1289_v61, 4 }
 0x283   : > { %v1005_v38 = vrot.slane %v1000_v33, 4  ;;  %v1008_v39 = vsel %vm925_vm7, %v1000_v33, %v1007_v5  ;;  %v1017_v21 = vrot.slane %v1004_v25, 4  ;;  %v1020_v43 = vsel %vm925_vm7, %v1004_v25, %v1019_v28 }
 0x284   : > { %v1016_v41 = vperm.slane %v1008_v39, %v4896_v27  ;;  %v1314_v44 = vperm.slane %v1308_v36, %v4896_v27  ;;  %v1320_v46 = vsel %vm925_vm7, %v1319_v37, %v1300_v29  ;;  %v1028_v49 = vperm.slane %v1020_v43, %v4896_v27 }
 0x285   : > { %v1006_v47 = vsel %vm925_vm7, %v1005_v38, %v988_v3  ;;  %v1018_v48 = vsel %vm925_vm7, %v1017_v21, %v992_v57  ;;  %v1326_v50 = vperm.slane %v1320_v46, %v4896_v27  ;;  %v1356_v51 = vsel %vm925_vm7, %v1355_v35, %v1282_v34 }
 0x286   : > { %v1012_v52 = vperm.slane %v1006_v47, %v4896_v27  ;;  %v1024_v53 = vperm.slane %v1018_v48, %v4896_v27  ;;  %v1031_v54 = vrot.slane %v1016_v41, 4  ;;  %v1277_v55 = vrot.slane %v4990_v26, 4 }
 0x287   : > { %v1035_v58 = vrot.slane %v1028_v49, 4  ;;  %v1331_v59 = vrot.slane %v1326_v50, 4  ;;  %v1321_v15 = vrot.slane %v1300_v29, 4  ;;  %v1344_v60 = vrot.slane %v4996_v30, 4 }
 0x288   : > { %v5018_v57 = vperm.slane %v1350_v31, %v4887_v13  ;;  %v1033_v62 = vrot.slane %v1024_v53, 4  ;;  %v1310_v3 = vsel %vm925_vm7, %v1295_v63, %v1309_v40  ;;  %v5022_v0 = vperm.slane %v1356_v51, %v4887_v13 }
 0x289   : > { %v1032_v1 = vsel %vm925_vm7, 0.0, %v1031_v54  ;;  %v1036_v4 = vsel %vm925_vm7, 0.0, %v1035_v58  ;;  %v1332_v6 = vsel %vm925_vm7, %v1331_v59, %v1314_v44  ;;  %v1029_v7 = vrot.slane %v1012_v52, 4 }
 0x28a   : > { %v1034_v9 = vsel %vm925_vm7, 0.0, %v1033_v62  ;;  %v1107_v10 = vrot.slane %v1036_v4, 4  ;;  %v5029_v12 = vsel %vm925_vm7, %v1031_v54, %v1012_v52  ;;  %v1393_v16 = vpack.c.bf16 %v1332_v6, %v1332_v6 }
 0x28b   : > { %v1318_v63 = vperm.slane %v1310_v3, %v4896_v27  ;;  %v1322_v19 = vsel %vm925_vm7, %v1306_v17, %v1321_v15  ;;  %v1096_v20 = vrot.slane %v1032_v1, 4  ;;  %v1102_v22 = vsel %vm925_vm7, %v1035_v58, %v1024_v53 }
 0x28c   : > { %v1330_v24 = vperm.slane %v1322_v19, %v4896_v27  ;;  %v1333_v61 = vrot.slane %v1314_v44, 4  ;;  %v1108_v5 = vsel %vm925_vm7, %v1107_v10, %v1034_v9  ;;  %v1655_v28 = vsel %vm1650_vm8, %v1393_v16, 0 }
 0x28d   : > { %v1337_v29 = vrot.slane %v1318_v63, 4  ;;  %v1041_v30 = vperm.slane %v4952_v42, %v4887_v13  ;;  %v1030_v31 = vsel %vm925_vm7, 0.0, %v1029_v7  ;;  %1664 = vmatpush.bf16.xpose.msra.mxu3 %v1655_v28  ;;  %v1047_v17 = vperm.slane %v4968_v56, %v4887_v13 }
 0x28e   : > { %v1334_v33 = vsel %vm925_vm7, %v1326_v50, %v1333_v61  ;;  %v1048_v25 = vsel %vm925_vm7, %v4936_v23, %v4931_v18  ;;  %v1335_v34 = vrot.slane %v1330_v24, 4  ;;  %v5049_v42 = vperm.slane %v1108_v5, %v4887_v13 }
 0x28f   : > { %v1338_v35 = vsel %vm925_vm7, %v1330_v24, %v1337_v29  ;;  %v1394_v36 = vpack.c.bf16 %v1334_v33, %v1334_v33  ;;  %v1052_v37 = vperm.slane %v1048_v25, %v4887_v13  ;;  %v1054_v39 = vsel %vm925_vm7, %v1053_v2, %v4955_v45 }
 0x290   : > { %v1396_v38 = vpack.c.bf16 %v1338_v35, %v1338_v35  ;;  %v1061_v56 = vrot.slane %v1041_v30, 4  ;;  %v1058_v18 = vperm.slane %v1054_v39, %v4887_v13  ;;  %v1059_v23 = vrot.slane %v1047_v17, 4 }
 0x291   : > { %v1674_v21 = vsel %vm1650_vm8, %v1394_v36, 0  ;;  %v1073_v40 = vrot.slane %v1052_v37, 4  ;;  %v1097_v41 = vsel %vm925_vm7, %v1096_v20, %v1030_v31  ;;  %v5059_v43 = vperm.slane %v1102_v22, %v4887_v13 }
 0x292   : > { %v1712_v44 = vsel %vm1650_vm8, %v1396_v38, 0  ;;  %v1062_v46 = vsel %vm925_vm7, %v1047_v17, %v1061_v56  ;;  %v1071_v32 = vrot.slane %v1058_v18, 4  ;;  %v1336_v47 = vsel %vm925_vm7, %v1335_v34, %v1318_v63 }
 0x293   : > { %1721 = vmatpush.bf16.xpose.msrb.mxu0 %v1712_v44  ;;  %v5064_v45 = vperm.slane %v1062_v46, %v4896_v27  ;;  %v1074_v2 = vsel %vm925_vm7, %v1058_v18, %v1073_v40  ;;  %v1125_v48 = vrot.slane %v5049_v42, 4  ;;  %v1278_v50 = vsel %vm925_vm7, 0.0, %v1277_v55 }
 0x294   : > { %v5070_v49 = vperm.slane %v1074_v2, %v4896_v27  ;;  %v1339_v51 = vsel %vm925_vm7, %v4982_v14, %v4990_v26  ;;  %v1060_v52 = vsel %vm925_vm7, %v1059_v23, %v1041_v30  ;;  %v1072_v53 = vsel %vm925_vm7, %v1071_v32, %v1052_v37 }
 0x295   : > { %1683 = vmatpush.bf16.xpose.msrb.mxu3 %v1674_v21  ;;  %v1089_v54 = vrot.slane %v5064_v45, 4  ;;  %v1343_v58 = vperm.slane %v1339_v51, %v4887_v13  ;;  %v5081_v59 = vperm.slane %v1072_v53, %v4896_v27  ;;  %v1395_v15 = vpack.c.bf16 %v1336_v47, %v1336_v47 }
 0x296   : > { %v1345_v62 = vsel %vm925_vm7, %v1344_v60, %v1278_v50  ;;  %v1373_v55 = vrot.slane %v5022_v0, 4  ;;  %v1375_v1 = vrot.slane %v5018_v57, 4  ;;  %v1066_v4 = vperm.slane %v1060_v52, %v4896_v27 }
 0x297   : > { %v1090_v3 = vsel %vm925_vm7, %v5070_v49, %v1089_v54  ;;  %v1349_v14 = vperm.slane %v1345_v62, %v4887_v13  ;;  %v1363_v26 = vrot.slane %v1343_v58, 4  ;;  %v1083_v6 = vrot.slane %v5081_v59, 4 }
 0x298   : > { %v1148_v7 = vpack.c.bf16 %v1090_v3, %v1090_v3  ;;  %v1374_v9 = vsel %vm925_vm7, %v1373_v55, %v5018_v57  ;;  %v1376_v63 = vsel %vm925_vm7, %v5022_v0, %v1375_v1  ;;  %v1127_v19 = vrot.slane %v5059_v43, 4 }
 0x299   : > { %v1361_v10 = vrot.slane %v1349_v14, 4  ;;  %v1380_v60 = vperm.slane %v1374_v9, %v4896_v27  ;;  %v1364_v16 = vsel %vm925_vm7, %v1349_v14, %v1363_v26  ;;  %v1084_v20 = vsel %vm925_vm7, %v1083_v6, %v1066_v4 }
 0x29a   : > { %3494 = vmatmul.msk.bf16.vlgmr.msrb.gmra.mxu0 %vm1650_vm8, %v1148_v7  ;;  %v1372_v22 = vperm.slane %v1364_v16, %v4896_v27  ;;  %v1384_v24 = vperm.slane %v1376_v63, %v4896_v27  ;;  %v1145_v61 = vpack.c.bf16 %v1084_v20, %v1084_v20  ;;  %v1095_v28 = vperm.slane %v5029_v12, %v4887_v13  ;;  %v897_v16 = vpop.f32.mrf.mxu2 }
 0x29b   : > { %v1362_v57 = vsel %vm925_vm7, %v1361_v10, %v1343_v58  ;;  %v1385_v5 = vrot.slane %v1380_v60, 4  ;;  %v1101_v30 = vperm.slane %v1097_v41, %v4887_v13  ;;  %v1126_v31 = vsel %vm925_vm7, %v1125_v48, %v5059_v43  ;;  %v1649_v10 = vld [vmem:[#allocation5] sm:$0xff] }
 0x29c   : > { %v1368_v29 = vperm.slane %v1362_v57, %v4896_v27  ;;  %v1391_v0 = vrot.slane %v1372_v22, 4  ;;  %3491 = vmatmul.msk.bf16.vlgmr.msra.gmra.mxu3 %vm1650_vm8, %v1145_v61  ;;  %v1693_v33 = vsel %vm1650_vm8, %v1395_v15, 0  ;;  %v1115_v17 = vrot.slane %v1095_v28, 4 }
 0x29d   : > { %v1132_v25 = vperm.slane %v1126_v31, %v4896_v27  ;;  %1702 = vmatpush.bf16.xpose.msra.mxu3 %v1693_v33  ;;  %v1113_v36 = vrot.slane %v1101_v30, 4  ;;  %v1128_v23 = vsel %vm925_vm7, %v5049_v42, %v1127_v19  ;;  %v1389_v46 = vrot.slane %v1384_v24, 4 }
 0x29e   : > { %v1386_v34 = vsel %vm925_vm7, %v1385_v5, %v1368_v29  ;;  %v1387_v35 = vrot.slane %v1368_v29, 4  ;;  %v1392_v12 = vsel %vm925_vm7, %v1384_v24, %v1391_v0  ;;  %v1116_v18 = vsel %vm925_vm7, %v1101_v30, %v1115_v17 }
 0x29f   : > { %v1397_v37 = vpack.c.bf16 %v1386_v34, %v1386_v34  ;;  %v1400_v38 = vpack.c.bf16 %v1392_v12, %v1392_v12  ;;  %v1137_v39 = vrot.slane %v1132_v25, 4  ;;  %v1114_v21 = vsel %vm925_vm7, %v1113_v36, %v1095_v28 }
 0x2a0   : > { %v1388_v56 = vsel %vm925_vm7, %v1380_v60, %v1387_v35  ;;  %v1120_v44 = vperm.slane %v1114_v21, %v4896_v27  ;;  %v1124_v32 = vperm.slane %v1116_v18, %v4896_v27  ;;  %v1085_v48 = vrot.slane %v1066_v4, 4 }
 0x2a1   : > { %v1731_v40 = vsel %vm1650_vm8, %v1397_v37, 0  ;;  %v1788_v41 = vsel %vm1650_vm8, %v1400_v38, 0  ;;  %v1398_v43 = vpack.c.bf16 %v1388_v56, %v1388_v56  ;;  %v1136_v42 = vperm.slane %v1128_v23, %v4896_v27 }
 0x2a2   : > { %1740 = vmatpush.bf16.xpose.msrb.mxu2 %v1731_v40  ;;  %1797 = vmatpush.bf16.xpose.msra.mxu0 %v1788_v41  ;;  %v1138_v47 = vsel %vm925_vm7, %v1137_v39, %v1120_v44  ;;  %v1143_v50 = vrot.slane %v1124_v32, 4  ;;  %v1390_v52 = vsel %vm925_vm7, %v1389_v46, %v1372_v22  ;;  %v1086_v58 = vsel %vm925_vm7, %v5081_v59, %v1085_v48  ;;  %v899_v24 = vpop.f32.mrf.mxu2 }
 0x2a3   : > { %v1750_v2 = vsel %vm1650_vm8, %v1398_v43, 0  ;;  %v1149_v51 = vpack.c.bf16 %v1138_v47, %v1138_v47  ;;  %v1399_v15 = vpack.c.bf16 %v1390_v52, %v1390_v52  ;;  %v1146_v62 = vpack.c.bf16 %v1086_v58, %v1086_v58 }
 0x2a4   : > { %v1144_v53 = vsel %vm925_vm7, %v1136_v42, %v1143_v50  ;;  %v1139_v3 = vrot.slane %v1120_v44, 4  ;;  %v1087_v14 = vrot.slane %v5070_v49, 4  ;;  %v1141_v6 = vrot.slane %v1136_v42, 4 }
 0x2a5   : > { %v1152_v54 = vpack.c.bf16 %v1144_v53, %v1144_v53  ;;  %v1769_v55 = vsel %vm1650_vm8, %v1399_v15, 0  ;;  %v728_v23 = vperm.slane %v4861_v11, 2 }
 0x2a6   : > { %v1140_v26 = vsel %vm925_vm7, %v1132_v25, %v1139_v3  ;;  %v1088_v59 = vsel %vm925_vm7, %v1087_v14, %v5064_v45  ;;  %v1142_v7 = vsel %vm925_vm7, %v1141_v6, %v1124_v32 }
 0x2a7   : > { %v1150_v1 = vpack.c.bf16 %v1140_v26, %v1140_v26  ;;  %v1147_v4 = vpack.c.bf16 %v1088_v59, %v1088_v59  ;;  %v1151_v9 = vpack.c.bf16 %v1142_v7, %v1142_v7  ;;  %v5159_v43 = vadd.f32 %v899_v24, %v728_v23 }
 0x2a8   : > { %v5162_v46 = vadd.f32 %v897_v16, %v728_v23 }
 0x2a9   : > { %3495 = vmatmul.msk.bf16.vlgmr.msrb.gmra.mxu2 %vm1650_vm8, %v1149_v51 }
 0x2aa   : > { %1759 = vmatpush.bf16.xpose.msra.mxu2 %v1750_v2  ;;  %3498 = vmatmul.msk.bf16.vlgmr.msra.gmra.mxu0 %vm1650_vm8, %v1152_v54  ;;  %v4059_v32 = vpack.i.bf16 %v5159_v43, %v5162_v46 }
 0x2ac   : > { %3492 = vmatmul.msk.bf16.vlgmr.msrb.gmra.mxu3 %vm1650_vm8, %v1146_v62 }
 0x2ad   : > { %1778 = vmatpush.bf16.xpose.msrb.mxu3 %v1769_v55 }
 0x2b9   : > { %3496 = vmatmul.msk.bf16.vlgmr.msra.gmra.mxu2 %vm1650_vm8, %v1150_v1 }
 0x2bc   : > { %3493 = vmatmul.msk.bf16.vlgmr.msra.gmra.mxu3 %vm1650_vm8, %v1147_v4 }
 0x2cc   : > { %3497 = vmatmul.msk.bf16.vlgmr.msrb.gmra.mxu3 %vm1650_vm8, %v1151_v9 }
 0x317   : > { %v1723_v60 = vpop.f32.mrf.mxu0 }
 0x318   : > { %v5142_v49 = vadd.f32 %v1723_v60, %v1649_v10 }
 0x31a   : > { %v1813_v45 = vsel %vm1803_vm9, %v5142_v49, -inf }
 0x31b   : > { %1814 = vmax.xlane.f32.xlu1 %v1813_v45 }
 0x31f   : > { %v1725_v63 = vpop.f32.mrf.mxu0  ;;  %v1666_v19 = vpop.f32.mrf.mxu3 }
 0x320   : > { %v1667_v20 = vadd.f32 %v1666_v19, %v1649_v10 }
 0x322   : > { %v1804_v22 = vsel %vm1803_vm9, %v1667_v20, -inf }
 0x323   : > { %1805 = vmax.xlane.f32.xlu2 %v1804_v22 }
 0x327   : > { %v1799_v61 = vpop.f32.mrf.mxu0  ;;  %v1668_v57 = vpop.f32.mrf.mxu3 }
 0x328   : > { %v5147_v5 = vadd.f32 %v1799_v61, %v1649_v10 }
 0x32a   : > { %v1825_v28 = vsel %vm1803_vm9, %v5147_v5, -inf }
 0x32b   : > { %1826 = vmax.xlane.f32.xlu0 %v1825_v28 }
 0x32c   : > { %v1742_v29 = vpop.f32.mrf.mxu2 }
 0x32d   : > { %v5151_v0 = vadd.f32 %v1742_v29, %v1649_v10 }
 0x32f   : > { %v1801_v30 = vpop.f32.mrf.mxu0  ;;  %v1816_v31 = vsel %vm1803_vm9, %v5151_v0, -inf  ;;  %v1685_v33 = vpop.f32.mrf.mxu3 }
 0x330   : > { %1817 = vmax.xlane.f32.xlu1 %v1816_v31  ;;  %v1686_v17 = vadd.f32 %v1685_v33, %v1649_v10 }
 0x332   : > { %v1807_v25 = vsel %vm1803_vm9, %v1686_v17, -inf }
 0x333   : > { %1808 = vmax.xlane.f32.xlu0 %v1807_v25 }
 0x334   : > { %v1744_v34 = vpop.f32.mrf.mxu2 }
 0x335   : > { %v1423_v34 = vrot.slane %v5162_v46, 4 }
 0x337   : > { %v1687_v35 = vpop.f32.mrf.mxu3 }
 0x33c   : > { %v1761_v12 = vpop.f32.mrf.mxu2 }
 0x33d   : > { %v1762_v36 = vadd.f32 %v1761_v12, %v1649_v10 }
 0x33f   : > { %v1819_v37 = vsel %vm1803_vm9, %v1762_v36, -inf  ;;  %v1704_v38 = vpop.f32.mrf.mxu3 }
 0x340   : > { %1820 = vmax.xlane.f32.xlu2 %v1819_v37  ;;  %v1705_v39 = vadd.f32 %v1704_v38, %v1649_v10  ;;  %v1479_v37 = vrot.slane %v5159_v43, 4 }
 0x342   : > { %v1810_v56 = vsel %vm1803_vm9, %v1705_v39, -inf }
 0x343   : > { %1811 = vmax.xlane.f32.xlu1 %v1810_v56 }
 0x344   : > { %v1763_v21 = vpop.f32.mrf.mxu2 }
 0x347   : > { %v1706_v18 = vpop.f32.mrf.mxu3 }
 0x34f   : > { %v1780_v40 = vpop.f32.mrf.mxu3 }
 0x350   : > { %v1781_v41 = vadd.f32 %v1780_v40, %v1649_v10 }
 0x352   : > { %v1822_v44 = vsel %vm1803_vm9, %v1781_v41, -inf }
 0x353   : > { %1823 = vmax.xlane.f32.xlu0 %v1822_v44 }
 0x357   : > { %v1782_v2 = vpop.f32.mrf.mxu3 }
 0x358   : > { %4060 = vrot.lane.b32.xlu2 %v4059_v32, %s4578_s26 }
 0x35c   : > { %4065 = vrot.lane.b32.xlu1 %v4059_v32, %s4579_s6 }
 0x367   : > { %4070 = vrot.lane.b32.xlu0 %v4059_v32, %s4577_s11 }
 0x38e   : > { %v1815_v52 = vpop.xlane.xlu1 %1814 }
 0x38f   : > { %v1831_v4 = vsub.f32 %v5142_v49, %v1815_v52 }
 0x391   : > { %v1842_v9 = vmul.f32 1.442695, %v1831_v4 }
 0x396   : > { %v1806_v11 = vpop.xlane.xlu2 %1805 }
 0x397   : > { %v1828_v47 = vsub.f32 %v1667_v20, %v1806_v11 }
 0x399   : > { %v1836_v48 = vmul.f32 1.442695, %v1828_v47 }
 0x39b   : > { %4101 = vpow2.f32 %v1836_v48 }
 0x39e   : > { %v1827_v42 = vpop.xlane.xlu0 %1826 }
 0x39f   : > { %v1835_v22 = vsub.f32 %v5147_v5, %v1827_v42 }
 0x3a1   : > { %v5169_v50 = vpop.eup %4101  ;;  %v1850_v57 = vmul.f32 1.442695, %v1835_v22 }
 0x3a2   : > { %v1852_v51 = vsel %vm1803_vm9, %v5169_v50, 0.0 }
 0x3a3   : > { %1853 = vadd.xlane.f32.xlu1 %v1852_v51  ;;  %v1818_v15 = vpop.xlane.xlu1 %1817 }
 0x3a4   : > { %v1832_v16 = vsub.f32 %v5151_v0, %v1818_v15 }
 0x3a6   : > { %v1809_v53 = vpop.xlane.xlu0 %1808  ;;  %v1844_v63 = vmul.f32 1.442695, %v1832_v16 }
 0x3a7   : > { %v1829_v54 = vsub.f32 %v1686_v17, %v1809_v53 }
 0x3a9   : > { %v1838_v58 = vmul.f32 1.442695, %v1829_v54 }
 0x3ab   : > { %4103 = vpow2.f32 %v1838_v58 }
 0x3b1   : > { %v5173_v62 = vpop.eup %4103 }
 0x3b2   : > { %v1855_v55 = vsel %vm1803_vm9, %v5173_v62, 0.0 }
 0x3b3   : > { %v1821_v3 = vpop.xlane.xlu2 %1820  ;;  %1856 = vadd.xlane.f32.xlu0 %v1855_v55 }
 0x3b4   : > { %v1833_v14 = vsub.f32 %v1762_v36, %v1821_v3 }
 0x3b6   : > { %v1846_v26 = vmul.f32 1.442695, %v1833_v14  ;;  %v1812_v1 = vpop.xlane.xlu1 %1811 }
 0x3b7   : > { %v1830_v59 = vsub.f32 %v1705_v39, %v1812_v1 }
 0x3b8   : > { %4105 = vpow2.f32 %v1846_v26 }
 0x3b9   : > { %v1840_v6 = vmul.f32 1.442695, %v1830_v59 }
 0x3bb   : > { %4107 = vpow2.f32 %v1840_v6  ;;  %v4061_v33 = vpop.permute.xlu2 %4060 }
 0x3bc   : > { %4109 = vpow2.f32 %v1842_v9  ;;  %v4063_v12 = vunpack.i.h.bf16 %v4061_v33  ;;  %v4062_v36 = vunpack.i.l.bf16 %v4061_v33 }
 0x3bd   : > { %4111 = vpow2.f32 %v1844_v63 }
 0x3be   : > { %v5178_v7 = vpop.eup %4105  ;;  %v1491_v23 = vrot.slane %v4063_v12, 4  ;;  %v1435_v40 = vrot.slane %v4062_v36, 4 }
 0x3bf   : > { %v1867_v10 = vsel %vm1803_vm9, %v5178_v7, 0.0 }
 0x3c0   : > { %1868 = vadd.xlane.f32.xlu1 %v1867_v10 }
 0x3c1   : > { %v5182_v60 = vpop.eup %4107 }
 0x3c2   : > { %v1858_v45 = vsel %vm1803_vm9, %v5182_v60, 0.0  ;;  %v5187_v19 = vpop.eup %4109 }
 0x3c3   : > { %1859 = vadd.xlane.f32.xlu2 %v1858_v45  ;;  %v1861_v61 = vsel %vm1803_vm9, %v5187_v19, 0.0  ;;  %v5192_v29 = vpop.eup %4111 }
 0x3c4   : > { %v1864_v17 = vsel %vm1803_vm9, %v5192_v29, 0.0 }
 0x3c6   : > { %v1824_v49 = vpop.xlane.xlu0 %1823 }
 0x3c7   : > { %v1834_v20 = vsub.f32 %v1781_v41, %v1824_v49 }
 0x3c9   : > { %v1848_v24 = vmul.f32 1.442695, %v1834_v20 }
 0x3cb   : > { %4113 = vpow2.f32 %v1848_v24  ;;  %1862 = vadd.xlane.f32.xlu2 %v1861_v61 }
 0x3cc   : > { %4115 = vpow2.f32 %v1850_v57 }
 0x3ce   : > { %v4066_v28 = vpop.permute.xlu1 %4065 }
 0x3cf   : > { %v4067_v0 = vunpack.i.l.bf16 %v4066_v28  ;;  %v4068_v30 = vunpack.i.h.bf16 %v4066_v28 }
 0x3d1   : > { %v5194_v31 = vpop.eup %4113  ;;  %v1421_v25 = vrot.slane %v4067_v0, 4  ;;  %v1477_v35 = vrot.slane %v4068_v30, 4  ;;  %v1424_v39 = vsel %vm925_vm7, %v4067_v0, %v1423_v34  ;;  %v1480_v56 = vsel %vm925_vm7, %v4068_v30, %v1479_v37 }
 0x3d2   : > { %v1870_v5 = vsel %vm1803_vm9, %v5194_v31, 0.0  ;;  %v5202_v38 = vpop.eup %4115  ;;  %v1432_v41 = vperm.slane %v1424_v39, %v4887_v13  ;;  %v1488_v2 = vperm.slane %v1480_v56, %v4887_v13 }
 0x3d3   : > { %1871 = vadd.xlane.f32.xlu0 %v1870_v5  ;;  %1865 = vadd.xlane.f32.xlu2 %v1864_v17  ;;  %v1422_v21 = vsel %vm925_vm7, %v1421_v25, %v5162_v46  ;;  %v1478_v18 = vsel %vm925_vm7, %v1477_v35, %v5159_v43  ;;  %v1873_v32 = vsel %vm1803_vm9, %v5202_v38, 0.0 }
 0x3d4   : > { %v1428_v11 = vperm.slane %v1422_v21, %v4887_v13  ;;  %v1484_v42 = vperm.slane %v1478_v18, %v4887_v13  ;;  %v1459_v53 = vrot.slane %v1432_v41, 4  ;;  %v1515_v15 = vrot.slane %v1488_v2, 4 }
 0x3d6   : > { %v1447_v55 = vrot.slane %v1428_v11, 4  ;;  %v1503_v6 = vrot.slane %v1484_v42, 4 }
 0x3d9   : > { %v4071_v44 = vpop.permute.xlu0 %4070 }
 0x3da   : > { %v4073_v47 = vunpack.i.h.bf16 %v4071_v44  ;;  %v4072_v48 = vunpack.i.l.bf16 %v4071_v44 }
 0x3db   : > { %1874 = vadd.xlane.f32.xlu0 %v1873_v32 }
 0x3dc   : > { %v1489_v46 = vrot.slane %v4073_v47, 4  ;;  %v1433_v51 = vrot.slane %v4072_v48, 4  ;;  %v1436_v43 = vsel %vm925_vm7, %v4072_v48, %v1435_v40  ;;  %v1492_v52 = vsel %vm925_vm7, %v4073_v47, %v1491_v23 }
 0x3dd   : > { %v1444_v54 = vperm.slane %v1436_v43, %v4887_v13  ;;  %v1500_v58 = vperm.slane %v1492_v52, %v4887_v13 }
 0x3de   : > { %v1434_v3 = vsel %vm925_vm7, %v1433_v51, %v4062_v36  ;;  %v1490_v14 = vsel %vm925_vm7, %v1489_v46, %v4063_v12 }
 0x3df   : > { %v1440_v26 = vperm.slane %v1434_v3, %v4887_v13  ;;  %v1457_v1 = vrot.slane %v1444_v54, 4  ;;  %v1460_v59 = vsel %vm925_vm7, %v1444_v54, %v1459_v53  ;;  %v1496_v4 = vperm.slane %v1490_v14, %v4887_v13 }
 0x3e0   : > { %v1468_v9 = vperm.slane %v1460_v59, %v4896_v27  ;;  %v1513_v10 = vrot.slane %v1500_v58, 4  ;;  %v1516_v16 = vsel %vm925_vm7, %v1500_v58, %v1515_v15 }
 0x3e1   : > { %v1445_v45 = vrot.slane %v1440_v26, 4  ;;  %v1448_v63 = vsel %vm925_vm7, %v1440_v26, %v1447_v55  ;;  %v1458_v49 = vsel %vm925_vm7, %v1457_v1, %v1432_v41  ;;  %v1501_v20 = vrot.slane %v1496_v4, 4 }
 0x3e2   : > { %v1456_v22 = vperm.slane %v1448_v63, %v4896_v27  ;;  %v1464_v24 = vperm.slane %v1458_v49, %v4896_v27  ;;  %v1475_v61 = vrot.slane %v1468_v9, 4  ;;  %v1504_v57 = vsel %vm925_vm7, %v1496_v4, %v1503_v6 }
 0x3e3   : > { %v1446_v28 = vsel %vm925_vm7, %v1445_v45, %v1428_v11  ;;  %v1502_v0 = vsel %vm925_vm7, %v1501_v20, %v1484_v42  ;;  %v1512_v30 = vperm.slane %v1504_v57, %v4896_v27  ;;  %v1514_v33 = vsel %vm925_vm7, %v1513_v10, %v1488_v2 }
 0x3e4   : > { %v1452_v5 = vperm.slane %v1446_v28, %v4896_v27  ;;  %v1471_v17 = vrot.slane %v1456_v22, 4  ;;  %v1473_v25 = vrot.slane %v1464_v24, 4  ;;  %v1476_v34 = vsel %vm925_vm7, 0.0, %v1475_v61 }
 0x3e5   : > { %v1508_v35 = vperm.slane %v1502_v0, %v4896_v27  ;;  %v1520_v12 = vperm.slane %v1514_v33, %v4896_v27  ;;  %v1524_v36 = vperm.slane %v1516_v16, %v4896_v27  ;;  %v1527_v37 = vrot.slane %v1512_v30, 4 }
 0x3e6   : > { %v1469_v39 = vrot.slane %v1452_v5, 4  ;;  %v1472_v56 = vsel %vm925_vm7, 0.0, %v1471_v17  ;;  %v1474_v21 = vsel %vm925_vm7, 0.0, %v1473_v25  ;;  %v1544_v18 = vsel %vm925_vm7, %v1475_v61, %v1464_v24 }
 0x3e7   : > { %v1525_v23 = vrot.slane %v1508_v35, 4  ;;  %v1528_v40 = vsel %vm925_vm7, 0.0, %v1527_v37  ;;  %v1529_v41 = vrot.slane %v1520_v12, 4  ;;  %v1531_v44 = vrot.slane %v1524_v36, 4 }
 0x3e8   : > { %v1538_v32 = vrot.slane %v1472_v56, 4  ;;  %v1548_v2 = vperm.slane %v1544_v18, %v4887_v13  ;;  %v1549_v11 = vrot.slane %v1476_v34, 4  ;;  %v1592_v47 = vrot.slane %v1528_v40, 4 }
 0x3e9   : > { %v1530_v48 = vsel %vm925_vm7, 0.0, %v1529_v41  ;;  %v1532_v42 = vsel %vm925_vm7, 0.0, %v1531_v44  ;;  %v1598_v46 = vsel %vm925_vm7, %v1531_v44, %v1520_v12  ;;  %v1470_v51 = vsel %vm925_vm7, 0.0, %v1469_v39 }
 0x3ea   : > { %v1602_v43 = vperm.slane %v1598_v46, %v4887_v13  ;;  %v1603_v52 = vrot.slane %v1532_v42, 4  ;;  %v1533_v53 = vsel %vm925_vm7, %v1471_v17, %v1452_v5  ;;  %v1539_v54 = vsel %vm925_vm7, %v1538_v32, %v1470_v51 }
 0x3eb   : > { %v1537_v58 = vperm.slane %v1533_v53, %v4887_v13  ;;  %v1543_v15 = vperm.slane %v1539_v54, %v4887_v13  ;;  %v1550_v55 = vsel %vm925_vm7, %v1549_v11, %v1474_v21  ;;  %v1569_v3 = vrot.slane %v1548_v2, 4 }
 0x3ec   : > { %v1554_v14 = vperm.slane %v1550_v55, %v4887_v13  ;;  %v1526_v26 = vsel %vm925_vm7, 0.0, %v1525_v23  ;;  %v1587_v1 = vsel %vm925_vm7, %v1527_v37, %v1508_v35  ;;  %v1604_v59 = vsel %vm925_vm7, %v1603_v52, %v1530_v48 }
 0x3ed   : > { %v1557_v4 = vrot.slane %v1537_v58, 4  ;;  %v1591_v6 = vperm.slane %v1587_v1, %v4887_v13  ;;  %v1593_v9 = vsel %vm925_vm7, %v1592_v47, %v1526_v26  ;;  %v1608_v10 = vperm.slane %v1604_v59, %v4887_v13 }
 0x3ee   : > { %v1570_v16 = vsel %vm925_vm7, %v1554_v14, %v1569_v3  ;;  %v1597_v45 = vperm.slane %v1593_v9, %v4887_v13  ;;  %v1623_v63 = vrot.slane %v1602_v43, 4  ;;  %v1555_v49 = vrot.slane %v1543_v15, 4 }
 0x3ef   : > { %v1558_v20 = vsel %vm925_vm7, %v1543_v15, %v1557_v4  ;;  %v1578_v22 = vperm.slane %v1570_v16, %v4896_v27  ;;  %v1611_v24 = vrot.slane %v1591_v6, 4  ;;  %v1567_v61 = vrot.slane %v1554_v14, 4 }
 0x3f0   : > { %v1566_v57 = vperm.slane %v1558_v20, %v4896_v27  ;;  %v1624_v28 = vsel %vm925_vm7, %v1608_v10, %v1623_v63  ;;  %v1556_v0 = vsel %vm925_vm7, %v1555_v49, %v1537_v58  ;;  %v1609_v30 = vrot.slane %v1597_v45, 4 }
 0x3f1   : > { %v1583_v33 = vrot.slane %v1578_v22, 4  ;;  %v1612_v5 = vsel %vm925_vm7, %v1597_v45, %v1611_v24  ;;  %v1632_v17 = vperm.slane %v1624_v28, %v4896_v27  ;;  %v1562_v25 = vperm.slane %v1556_v0, %v4896_v27 }
 0x3f2   : > { %v1620_v34 = vperm.slane %v1612_v5, %v4896_v27  ;;  %v1568_v35 = vsel %vm925_vm7, %v1567_v61, %v1548_v2  ;;  %v1585_v12 = vrot.slane %v1566_v57, 4  ;;  %v1610_v36 = vsel %vm925_vm7, %v1609_v30, %v1591_v6 }
 0x3f3   : > { %v1584_v37 = vsel %vm925_vm7, %v1583_v33, %v1566_v57  ;;  %v1637_v39 = vrot.slane %v1632_v17, 4  ;;  %v1574_v56 = vperm.slane %v1568_v35, %v4896_v27  ;;  %v1581_v21 = vrot.slane %v1562_v25, 4 }
 0x3f4   : > { %v1643_v18 = vpack.c.bf16 %v1584_v37, %v1584_v37  ;;  %v1586_v23 = vsel %vm925_vm7, %v1578_v22, %v1585_v12  ;;  %v1616_v40 = vperm.slane %v1610_v36, %v4896_v27  ;;  %v1621_v41 = vrot.slane %v1608_v10, 4 }
 0x3f5   : > { %v1638_v44 = vsel %vm925_vm7, %v1637_v39, %v1620_v34  ;;  %v1579_v32 = vrot.slane %v1574_v56, 4  ;;  %v1644_v11 = vpack.c.bf16 %v1586_v23, %v1586_v23  ;;  %v1639_v2 = vrot.slane %v1620_v34, 4 }
 0x3f6   : > { %v1943_v47 = vsel %vm1903_vm10, %v1643_v18, 0  ;;  %v1647_v48 = vpack.c.bf16 %v1638_v44, %v1638_v44  ;;  %v1622_v42 = vsel %vm925_vm7, %v1621_v41, %v1602_v43  ;;  %v1582_v46 = vsel %vm925_vm7, %v1574_v56, %v1581_v21 }
 0x3f7   : > { %1952 = vmatpush.bf16.msra.mxu3 %v1943_v47  ;;  %v1580_v51 = vsel %vm925_vm7, %v1579_v32, %v1562_v25  ;;  %v1962_v52 = vsel %vm1903_vm10, %v1644_v11, 0  ;;  %v1628_v53 = vperm.slane %v1622_v42, %v4896_v27  ;;  %v1640_v54 = vsel %vm925_vm7, %v1632_v17, %v1639_v2 }
 0x3f8   : > { %v2019_v58 = vsel %vm1903_vm10, %v1647_v48, 0  ;;  %v1641_v15 = vpack.c.bf16 %v1580_v51, %v1580_v51  ;;  %1971 = vmatpush.bf16.msrb.mxu0 %v1962_v52  ;;  %v1648_v55 = vpack.c.bf16 %v1640_v54, %v1640_v54  ;;  %v1642_v3 = vpack.c.bf16 %v1582_v46, %v1582_v46 }
 0x3f9   : > { %v1633_v14 = vrot.slane %v1628_v53, 4  ;;  %v1635_v43 = vrot.slane %v1616_v40, 4 }
 0x3fa   : > { %v1905_v26 = vsel %vm1903_vm10, %v1641_v15, 0  ;;  %v2038_v1 = vsel %vm1903_vm10, %v1648_v55, 0  ;;  %v1924_v59 = vsel %vm1903_vm10, %v1642_v3, 0 }
 0x3fb   : > { %2028 = vmatpush.bf16.msrb.mxu3 %v2019_v58  ;;  %1914 = vmatpush.bf16.msrb.mxu1 %v1905_v26  ;;  %v1634_v4 = vsel %vm925_vm7, %v1633_v14, %v1616_v40  ;;  %v1636_v6 = vsel %vm925_vm7, %v1628_v53, %v1635_v43 }
 0x3fc   : > { %2047 = vmatpush.bf16.msra.mxu0 %v2038_v1  ;;  %v1645_v9 = vpack.c.bf16 %v1634_v4, %v1634_v4  ;;  %1933 = vmatpush.bf16.msrb.mxu2 %v1924_v59  ;;  %v1646_v10 = vpack.c.bf16 %v1636_v6, %v1636_v6 }
 0x3fe   : > { %v1981_v16 = vsel %vm1903_vm10, %v1645_v9, 0  ;;  %v2000_v45 = vsel %vm1903_vm10, %v1646_v10, 0 }
 0x3ff   : > { %1990 = vmatpush.bf16.msra.mxu1 %v1981_v16 }
 0x400   : > { %2009 = vmatpush.bf16.msra.mxu2 %v2000_v45 }
 0x416   : > { %v1854_v63 = vpop.xlane.xlu1 %1853 }
 0x417   : > { %4117 = vrcp.f32 %v1854_v63 }
 0x41d   : > { %v4118_v49 = vpop.eup %4117 }
 0x41e   : > { %v1884_v20 = vmul.f32 %v4118_v49, %v5169_v50 }
 0x420   : > { %v1892_v22 = vpack.c.bf16 %v1884_v20, %v1884_v20 }
 0x422   : > { %3499 = vmatmul.msk.bf16.vlgmr.msrb.gmra.mxu1 %vm1803_vm9, %v1892_v22 }
 0x426   : > { %v1857_v24 = vpop.xlane.xlu0 %1856 }
 0x427   : > { %4119 = vrcp.f32 %v1857_v24 }
 0x42d   : > { %v4120_v61 = vpop.eup %4119 }
 0x42e   : > { %v1885_v57 = vmul.f32 %v4120_v61, %v5173_v62 }
 0x430   : > { %v1893_v28 = vpack.c.bf16 %v1885_v57, %v1885_v57 }
 0x432   : > { %3500 = vmatmul.msk.bf16.vlgmr.msrb.gmra.mxu2 %vm1803_vm9, %v1893_v28 }
 0x433   : > { %v1869_v0 = vpop.xlane.xlu1 %1868 }
 0x434   : > { %4121 = vrcp.f32 %v1869_v0 }
 0x436   : > { %v1860_v30 = vpop.xlane.xlu2 %1859 }
 0x437   : > { %4123 = vrcp.f32 %v1860_v30 }
 0x43a   : > { %v4122_v33 = vpop.eup %4121 }
 0x43b   : > { %v1889_v5 = vmul.f32 %v4122_v33, %v5178_v7 }
 0x43d   : > { %v4124_v17 = vpop.eup %4123  ;;  %v1897_v34 = vpack.c.bf16 %v1889_v5, %v1889_v5 }
 0x43e   : > { %v1886_v50 = vmul.f32 %v4124_v17, %v5182_v60  ;;  %v1863_v25 = vpop.xlane.xlu2 %1862 }
 0x43f   : > { %4125 = vrcp.f32 %v1863_v25 }
 0x440   : > { %v1894_v35 = vpack.c.bf16 %v1886_v50, %v1886_v50 }
 0x442   : > { %3501 = vmatmul.msk.bf16.vlgmr.msra.gmra.mxu3 %vm1803_vm9, %v1894_v35  ;;  %3504 = vmatmul.msk.bf16.vlgmr.msra.gmra.mxu2 %vm1803_vm9, %v1897_v34 }
 0x445   : > { %v4126_v62 = vpop.eup %4125 }
 0x446   : > { %v1887_v12 = vmul.f32 %v4126_v62, %v5187_v19  ;;  %v1872_v36 = vpop.xlane.xlu0 %1871  ;;  %v1866_v37 = vpop.xlane.xlu2 %1865 }
 0x447   : > { %4127 = vrcp.f32 %v1872_v36 }
 0x448   : > { %v1895_v39 = vpack.c.bf16 %v1887_v12, %v1887_v12  ;;  %4129 = vrcp.f32 %v1866_v37 }
 0x44a   : > { %3502 = vmatmul.msk.bf16.vlgmr.msrb.gmra.mxu0 %vm1803_vm9, %v1895_v39 }
 0x44d   : > { %v4128_v7 = vpop.eup %4127 }
 0x44e   : > { %v4130_v60 = vpop.eup %4129  ;;  %v1890_v56 = vmul.f32 %v4128_v7, %v5194_v31  ;;  %v1875_v21 = vpop.xlane.xlu0 %1874 }
 0x44f   : > { %v1888_v18 = vmul.f32 %v4130_v60, %v5192_v29  ;;  %4131 = vrcp.f32 %v1875_v21 }
 0x450   : > { %v1898_v23 = vpack.c.bf16 %v1890_v56, %v1890_v56 }
 0x451   : > { %v1896_v40 = vpack.c.bf16 %v1888_v18, %v1888_v18 }
 0x452   : > { %3505 = vmatmul.msk.bf16.vlgmr.msrb.gmra.mxu3 %vm1803_vm9, %v1898_v23 }
 0x453   : > { %3503 = vmatmul.msk.bf16.vlgmr.msra.gmra.mxu1 %vm1803_vm9, %v1896_v40 }
 0x455   : > { %v4132_v19 = vpop.eup %4131 }
 0x456   : > { %v1891_v41 = vmul.f32 %v4132_v19, %v5202_v38 }
 0x458   : > { %v1899_v44 = vpack.c.bf16 %v1891_v41, %v1891_v41 }
 0x45a   : > { %3506 = vmatmul.msk.bf16.vlgmr.msra.gmra.mxu0 %vm1803_vm9, %v1899_v44 }
 0x49f   : > { %v1916_v32 = vpop.f32.mrf.mxu1 }
 0x4a0   : > { %v2055_v47 = vrot.slane %v1916_v32, 4 }
 0x4a7   : > { %v1918_v11 = vpop.f32.mrf.mxu1 }
 0x4b5   : > { %v1935_v2 = vpop.f32.mrf.mxu2 }
 0x4b6   : > { %v2067_v42 = vrot.slane %v1935_v2, 4 }
 0x4bd   : > { %v1937_v31 = vpop.f32.mrf.mxu2 }
 0x4c5   : > { %v1954_v48 = vpop.f32.mrf.mxu3  ;;  %v5312_v29 = vpop.f32.mrf.mxu2 }
 0x4c6   : > { %v2053_v46 = vrot.slane %v1954_v48, 4  ;;  %v2056_v51 = vsel %vm925_vm7, %v1954_v48, %v2055_v47  ;;  %v2123_v7 = vrot.slane %v5312_v29, 4 }
 0x4c7   : > { %v2064_v52 = vperm.slane %v2056_v51, %v4887_v13  ;;  %v1973_v53 = vpop.f32.mrf.mxu0 }
 0x4c8   : > { %v2054_v38 = vsel %vm925_vm7, %v2053_v46, %v1916_v32  ;;  %v2065_v54 = vrot.slane %v1973_v53, 4  ;;  %v2068_v58 = vsel %vm925_vm7, %v1973_v53, %v2067_v42 }
 0x4c9   : > { %v2060_v15 = vperm.slane %v2054_v38, %v4887_v13  ;;  %v2091_v55 = vrot.slane %v2064_v52, 4  ;;  %v2076_v3 = vperm.slane %v2068_v58, %v4887_v13 }
 0x4ca   : > { %v2066_v14 = vsel %vm925_vm7, %v2065_v54, %v1935_v2 }
 0x4cb   : > { %v2079_v43 = vrot.slane %v2060_v15, 4  ;;  %v2072_v26 = vperm.slane %v2066_v14, %v4887_v13  ;;  %v2089_v1 = vrot.slane %v2076_v3, 4  ;;  %v2092_v59 = vsel %vm925_vm7, %v2076_v3, %v2091_v55 }
 0x4cc   : > { %v2100_v4 = vperm.slane %v2092_v59, %v4896_v27 }
 0x4cd   : > { %v2077_v6 = vrot.slane %v2072_v26, 4  ;;  %v2080_v9 = vsel %vm925_vm7, %v2072_v26, %v2079_v43  ;;  %v2090_v10 = vsel %vm925_vm7, %v2089_v1, %v2064_v52  ;;  %v1956_v16 = vpop.f32.mrf.mxu3  ;;  %v2013_v45 = vpop.f32.mrf.mxu2 }
 0x4ce   : > { %v2088_v63 = vperm.slane %v2080_v9, %v4896_v27  ;;  %v2096_v49 = vperm.slane %v2090_v10, %v4896_v27  ;;  %v2107_v20 = vrot.slane %v2100_v4, 4 }
 0x4cf   : > { %v2078_v22 = vsel %vm925_vm7, %v2077_v6, %v2060_v15  ;;  %v1975_v24 = vpop.f32.mrf.mxu0 }
 0x4d0   : > { %v2084_v61 = vperm.slane %v2078_v22, %v4896_v27  ;;  %v2103_v57 = vrot.slane %v2088_v63, 4  ;;  %v2105_v28 = vrot.slane %v2096_v49, 4  ;;  %v2108_v0 = vsel %vm925_vm7, 0.0, %v2107_v20  ;;  %v1992_v30 = vpop.f32.mrf.mxu1 }
 0x4d1   : > { %v2181_v33 = vrot.slane %v2108_v0, 4  ;;  %v2176_v35 = vsel %vm925_vm7, %v2107_v20, %v2096_v49  ;;  %v2111_v37 = vrot.slane %v1992_v30, 4 }
 0x4d2   : > { %v2101_v5 = vrot.slane %v2084_v61, 4  ;;  %v2104_v17 = vsel %vm925_vm7, 0.0, %v2103_v57  ;;  %v2106_v50 = vsel %vm925_vm7, 0.0, %v2105_v28  ;;  %v2165_v25 = vsel %vm925_vm7, %v2103_v57, %v2084_v61 }
 0x4d3   : > { %v2170_v34 = vrot.slane %v2104_v17, 4  ;;  %v2182_v62 = vsel %vm925_vm7, %v2181_v33, %v2106_v50  ;;  %v2169_v12 = vperm.slane %v2165_v25, %v4887_v13  ;;  %v2180_v21 = vperm.slane %v2176_v35, %v4887_v13 }
 0x4d4   : > { %v2186_v36 = vperm.slane %v2182_v62, %v4887_v13  ;;  %v2102_v39 = vsel %vm925_vm7, 0.0, %v2101_v5 }
 0x4d5   : > { %v2030_v60 = vpop.f32.mrf.mxu3  ;;  %v2171_v56 = vsel %vm925_vm7, %v2170_v34, %v2102_v39  ;;  %v2189_v44 = vrot.slane %v2169_v12, 4  ;;  %v2201_v51 = vrot.slane %v2180_v21, 4 }
 0x4d6   : > { %v2109_v18 = vrot.slane %v2030_v60, 4  ;;  %v2112_v23 = vsel %vm925_vm7, %v2030_v60, %v2111_v37  ;;  %v2175_v40 = vperm.slane %v2171_v56, %v4887_v13  ;;  %v2199_v47 = vrot.slane %v2186_v36, 4 }
 0x4d7   : > { %v2120_v19 = vperm.slane %v2112_v23, %v4887_v13  ;;  %v2049_v41 = vpop.f32.mrf.mxu0  ;;  %v2202_v10 = vsel %vm925_vm7, %v2186_v36, %v2201_v51 }
 0x4d8   : > { %v2110_v32 = vsel %vm925_vm7, %v2109_v18, %v1992_v30  ;;  %v1994_v11 = vpop.f32.mrf.mxu1  ;;  %v2121_v2 = vrot.slane %v2049_v41, 4  ;;  %v2124_v31 = vsel %vm925_vm7, %v2049_v41, %v2123_v7  ;;  %v2187_v53 = vrot.slane %v2175_v40, 4 }
 0x4d9   : > { %v2116_v48 = vperm.slane %v2110_v32, %v4887_v13  ;;  %v2147_v42 = vrot.slane %v2120_v19, 4  ;;  %v2132_v46 = vperm.slane %v2124_v31, %v4887_v13  ;;  %v2190_v3 = vsel %vm925_vm7, %v2175_v40, %v2189_v44 }
 0x4da   : > { %v2122_v52 = vsel %vm925_vm7, %v2121_v2, %v5312_v29  ;;  %v2188_v14 = vsel %vm925_vm7, %v2187_v53, %v2169_v12  ;;  %v2200_v43 = vsel %vm925_vm7, %v2199_v47, %v2180_v21  ;;  %v2198_v63 = vperm.slane %v2190_v3, %v4896_v27 }
 0x4db   : > { %v2135_v38 = vrot.slane %v2116_v48, 4  ;;  %v2128_v54 = vperm.slane %v2122_v52, %v4887_v13  ;;  %v2145_v58 = vrot.slane %v2132_v46, 4  ;;  %v2148_v15 = vsel %vm925_vm7, %v2132_v46, %v2147_v42 }
 0x4dc   : > { %v2156_v55 = vperm.slane %v2148_v15, %v4896_v27  ;;  %v2194_v49 = vperm.slane %v2188_v14, %v4896_v27  ;;  %v2206_v20 = vperm.slane %v2200_v43, %v4896_v27  ;;  %v2210_v30 = vperm.slane %v2202_v10, %v4896_v27  ;;  %v3833_v10 = vld [vmem:[#allocation11] sm:$0xff] }
 0x4dd   : > { %v2133_v26 = vrot.slane %v2128_v54, 4  ;;  %v2136_v1 = vsel %vm925_vm7, %v2128_v54, %v2135_v38  ;;  %v2146_v29 = vsel %vm925_vm7, %v2145_v58, %v2120_v19  ;;  %v2032_v59 = vpop.f32.mrf.mxu3  ;;  %v2217_v19 = vrot.slane %v2198_v63, 4 }
 0x4de   : > { %v2144_v4 = vperm.slane %v2136_v1, %v4896_v27  ;;  %v2152_v6 = vperm.slane %v2146_v29, %v4896_v27  ;;  %v2163_v9 = vrot.slane %v2156_v55, 4  ;;  %v2211_v33 = vrot.slane %v2206_v20, 4  ;;  %v3839_v1 = vld [vmem:[#allocation11 + $0x30] sm:$0xff]  ;;  %v3838_v29 = vld [vmem:[#allocation11 + $0x28] sm:$0xff]  ;;  %v3837_v59 = vld [vmem:[#allocation11 + $0x20] sm:$0xff] }
 0x4df   : > { %v2134_v16 = vsel %vm925_vm7, %v2133_v26, %v2116_v48  ;;  %v2051_v45 = vpop.f32.mrf.mxu0  ;;  %v2215_v23 = vrot.slane %v2210_v30, 4  ;;  %v2213_v42 = vrot.slane %v2194_v49, 4  ;;  %v2218_v38 = vsel %vm925_vm7, %v2210_v30, %v2217_v19  ;;  %v3840_v26 = vld [vmem:[#allocation11 + $0x38] sm:$0xff] }
 0x4e0   : > { %v2140_v22 = vperm.slane %v2134_v16, %v4896_v27  ;;  %v2159_v24 = vrot.slane %v2144_v4, 4  ;;  %v2161_v61 = vrot.slane %v2152_v6, 4  ;;  %v2164_v57 = vsel %vm925_vm7, 0.0, %v2163_v9  ;;  %2374 = vmatpush.bf16.msrb.mxu1 %v3840_v26  ;;  %v3836_v4 = vld [vmem:[#allocation11 + $0x18] sm:$0xff]  ;;  %v3647_v26 = vld [vmem:[#allocation16 + $0xd8] sm:$0xf0] }
 0x4e1   : > { %v2230_v28 = vsel %vm925_vm7, %v2163_v9, %v2152_v6  ;;  %v2235_v0 = vrot.slane %v2164_v57, 4  ;;  %v5379_v39 = vsel %vm925_vm7, %v2211_v33, %v2194_v49  ;;  %v2216_v52 = vsel %vm925_vm7, %v2215_v23, %v2198_v63  ;;  %v3835_v6 = vld [vmem:[#allocation11 + $0x10] sm:$0xff]  ;;  %v3834_v9 = vld [vmem:[#allocation11 + $0x8] sm:$0xff] }
 0x4e2   : > { %v2157_v5 = vrot.slane %v2140_v22, 4  ;;  %v2160_v17 = vsel %vm925_vm7, 0.0, %v2159_v24  ;;  %v2162_v50 = vsel %vm925_vm7, 0.0, %v2161_v61  ;;  %v2219_v25 = vsel %vm925_vm7, %v2159_v24, %v2140_v22 }
 0x4e3   : > { %v2224_v34 = vrot.slane %v2160_v17, 4  ;;  %v2234_v35 = vperm.slane %v2230_v28, %v4887_v13  ;;  %v2236_v62 = vsel %vm925_vm7, %v2235_v0, %v2162_v50  ;;  %v2223_v12 = vperm.slane %v2219_v25, %v4887_v13  ;;  %v4091_v25 = vld [vmem:[#allocation13] ss:$0 sm:$0xff] }
 0x4e4   : > { %v2240_v36 = vperm.slane %v2236_v62, %v4887_v13  ;;  %v2158_v37 = vsel %vm925_vm7, 0.0, %v2157_v5  ;;  %v2214_v14 = vsel %vm925_vm7, %v2206_v20, %v2213_v42  ;;  %2375 = vmatpush.bf16.msrb.mxu1 %v3839_v1  ;;  %v4169_v62 = vld [vmem:[%s4814_s18] sm:$0xff] }
 0x4e5   : > { %v2255_v7 = vrot.slane %v2234_v35, 4  ;;  %v2225_v60 = vsel %vm925_vm7, %v2224_v34, %v2158_v37  ;;  %v2243_v56 = vrot.slane %v2223_v12, 4 }
 0x4e6   : > { %v2229_v21 = vperm.slane %v2225_v60, %v4887_v13  ;;  %v2253_v18 = vrot.slane %v2240_v36, 4 }
 0x4e7   : > { %v2256_v40 = vsel %vm925_vm7, %v2240_v36, %v2255_v7 }
 0x4e8   : > { %v2244_v41 = vsel %vm925_vm7, %v2229_v21, %v2243_v56  ;;  %v2264_v44 = vperm.slane %v2256_v40, %v4896_v27  ;;  %v2241_v32 = vrot.slane %v2229_v21, 4  ;;  %v2254_v11 = vsel %vm925_vm7, %v2253_v18, %v2234_v35  ;;  %2376 = vmatpush.bf16.msrb.mxu1 %v3838_v29  ;;  %v3621_v29 = vld [vmem:[#allocation16 + $0xa0] sm:$0xf] }
 0x4e9   : > { %v2252_v2 = vperm.slane %v2244_v41, %v4896_v27  ;;  %v2260_v31 = vperm.slane %v2254_v11, %v4896_v27  ;;  %v3869_v11 = vld [vmem:[#allocation16 + $0xe4] sm:$0xf] }
 0x4ea   : > { %v2269_v47 = vrot.slane %v2264_v44, 4  ;;  %v2242_v48 = vsel %vm925_vm7, %v2241_v32, %v2223_v12  ;;  %v3871_v32 = vld [vmem:[#allocation16 + $0xec] sm:$0xf0] }
 0x4eb   : > { %v2271_v13 = vrot.slane %v2252_v2, 4  ;;  %v2248_v46 = vperm.slane %v2242_v48, %v4896_v27  ;;  %v2265_v51 = vrot.slane %v2260_v31, 4  ;;  %v3872_v48 = vld [vmem:[#allocation16 + $0xf4] sm:$0xf0] }
 0x4ec   : > { %v2270_v53 = vsel %vm925_vm7, %v2269_v47, %v2252_v2  ;;  %2377 = vmatpush.bf16.msrb.mxu1 %v3837_v59  ;;  %v3661_v47 = vld [vmem:[#allocation16 + $0xe8] sm:$0xf]  ;;  %v3863_v59 = vld [vmem:[#allocation16 + $0xac] sm:$0xf0] }
 0x4ed   : > { %v4079_v54 = vpack.i.bf16 %v2270_v53, %v2216_v52  ;;  %v2272_v58 = vsel %vm925_vm7, %v2264_v44, %v2271_v13  ;;  %v2267_v15 = vrot.slane %v2248_v46, 4  ;;  %v2266_v55 = vsel %vm925_vm7, %v2265_v51, %v2248_v46  ;;  %v3653_v44 = vld [vmem:[#allocation16 + $0xe0] sm:$0xf]  ;;  %v3870_v46 = vld [vmem:[#allocation16 + $0xec] sm:$0xf] }
 0x4ee   : > { %v4084_v3 = vpack.i.bf16 %v2272_v58, %v2218_v38  ;;  %v3654_v2 = vor.u32 %v3871_v32, %v3653_v44  ;;  %v3662_v42 = vor.u32 %v3872_v48, %v3661_v47  ;;  %v3663_v51 = vld [vmem:[#allocation16 + $0xf8] sm:$0xf0]  ;;  %v3637_v53 = vld [vmem:[#allocation16 + $0xc0] sm:$0xf]  ;;  %v3867_v38 = vld [vmem:[#allocation16 + $0xcc] sm:$0xf0] }
 0x4ef   : > { %4080 = vrot.lane.b32.xlu2 %v4079_v54, %s4579_s6  ;;  %v2268_v27 = vsel %vm925_vm7, %v2260_v31, %v2267_v15  ;;  %v3655_v31 = vld [vmem:[#allocation16 + $0xf0] sm:$0xf0]  ;;  %v3666_v52 = vor.u32 %v3870_v46, %v3663_v51  ;;  %v3865_v54 = vld [vmem:[#allocation16 + $0xc4] sm:$0xf]  ;;  %v3638_v58 = vor.u32 %v3867_v38, %v3637_v53  ;;  %v3854_v32 = vld [vmem:[#allocation16 + $0x6c] sm:$0xf] }
 0x4f0   : > { %4085 = vrot.lane.b32.xlu0 %v4084_v3, %s4578_s26  ;;  %v4074_v43 = vpack.i.bf16 %v2268_v27, %v2214_v14  ;;  %2378 = vmatpush.bf16.msrb.mxu1 %v3836_v4  ;;  %v3658_v13 = vor.u32 %v3869_v11, %v3655_v31  ;;  %v3639_v15 = vld [vmem:[#allocation16 + $0xd0] sm:$0xf0]  ;;  %v3868_v3 = vld [vmem:[#allocation16 + $0xd4] sm:$0xf0]  ;;  %v3861_v4 = vld [vmem:[#allocation16 + $0xa4] sm:$0xf] }
 0x4f1   : > { %2645 = vmatpush.bf16.msrb.mxu2 %v3654_v2  ;;  %2673 = vmatpush.bf16.msrb.mxu0 %v3662_v42  ;;  %v3642_v14 = vor.u32 %v3865_v54, %v3639_v15  ;;  %v3599_v11 = vld [vmem:[#allocation16 + $0x78] sm:$0xf0]  ;;  %v3573_v2 = vld [vmem:[#allocation16 + $0x40] sm:$0xf]  ;;  %v3851_v47 = vld [vmem:[#allocation16 + $0x4c] sm:$0xf0] }
 0x4f2   : > { %4075 = vrot.lane.b32.xlu1 %v4074_v43, %s4577_s11  ;;  %2659 = vmatpush.bf16.msra.mxu3 %v3658_v13  ;;  %v3866_v43 = vld [vmem:[#allocation16 + $0xcc] sm:$0xf]  ;;  %v3602_v31 = vor.u32 %v3854_v32, %v3599_v11  ;;  %v3849_v48 = vld [vmem:[#allocation16 + $0x44] sm:$0xf]  ;;  %v3575_v13 = vld [vmem:[#allocation16 + $0x50] sm:$0xf0]  ;;  %v3574_v42 = vor.u32 %v3851_v47, %v3573_v2 }
 0x4f3   : > { %v3650_v1 = vor.u32 %v3866_v43, %v3647_v26  ;;  %v3581_v46 = vld [vmem:[#allocation16 + $0x48] sm:$0xf]  ;;  %v3852_v51 = vld [vmem:[#allocation16 + $0x54] sm:$0xf0]  ;;  %v3578_v53 = vor.u32 %v3849_v48, %v3575_v13  ;;  %v3583_v54 = vld [vmem:[#allocation16 + $0x58] sm:$0xf0] }
 0x4f4   : > { %2379 = vmatpush.bf16.msrb.mxu1 %v3835_v6  ;;  %v3622_v6 = vor.u32 %v3863_v59, %v3621_v29  ;;  %v3582_v38 = vor.u32 %v3852_v51, %v3581_v46  ;;  %v3847_v15 = vld [vmem:[#allocation16 + $0x2c] sm:$0xf0]  ;;  %v3565_v43 = vld [vmem:[#allocation16 + $0x28] sm:$0xf]  ;;  %v3846_v29 = vld [vmem:[#allocation16 + $0x2c] sm:$0xf] }
 0x4f5   : > { %2646 = vmatpush.bf16.msrb.mxu2 %v3638_v58  ;;  %v3557_v58 = vld [vmem:[#allocation16 + $0x20] sm:$0xf]  ;;  %v3567_v59 = vld [vmem:[#allocation16 + $0x38] sm:$0xf0]  ;;  %v3895_v46 = vld [vmem:[#allocation17 + $0xb0] sm:$0xff]  ;;  %s5711_s26 = sld [smem:[#allocation35_spill]] }
 0x4f6   : > { %2660 = vmatpush.bf16.msra.mxu3 %v3642_v14  ;;  %v3845_v14 = vld [vmem:[#allocation16 + $0x24] sm:$0xf]  ;;  %v3896_v48 = vld [vmem:[#allocation17 + $0xb8] sm:$0xff]  ;;  %v3903_v51 = vld [vmem:[#allocation17 + $0xf0] sm:$0xff] }
 0x4f8   : > { %2380 = vmatpush.bf16.msrb.mxu1 %v3834_v9  ;;  %v3623_v9 = vld [vmem:[#allocation16 + $0xb0] sm:$0xf0] }
 0x4f9   : > { %2647 = vmatpush.bf16.msrb.mxu2 %v3622_v6  ;;  %v3541_v6 = vld [vmem:[#allocation16] sm:$0xf] }
 0x4fb   : > { %s4491_s1 = scalar_lea.hbm %s5711_s26, 32 }
 0x4fc   : > { %2381 = vmatpush.bf16.msrb.mxu1 %v3833_v10  ;;  %v3629_v10 = vld [vmem:[#allocation16 + $0xa8] sm:$0xf] }
 0x500   : > { %2687 = vmatpush.bf16.msra.mxu1 %v3666_v52  ;;  %v3850_v52 = vld [vmem:[#allocation16 + $0x4c] sm:$0xf] }
 0x504   : > { %2688 = vmatpush.bf16.msra.mxu1 %v3650_v1  ;;  %v3848_v1 = vld [vmem:[#allocation16 + $0x34] sm:$0xf0] }
 0x549   : > { %v4081_v16 = vpop.permute.xlu2 %4080 }
 0x54a   : > { %v4083_v22 = vunpack.i.h.bf16 %v4081_v16  ;;  %v4082_v24 = vunpack.i.l.bf16 %v4081_v16  ;;  %v3864_v16 = vld [vmem:[#allocation16 + $0xb4] sm:$0xf0] }
 0x562   : > { %v4086_v45 = vpop.permute.xlu0 %4085 }
 0x563   : > { %v4088_v61 = vunpack.i.h.bf16 %v4086_v45  ;;  %v4087_v57 = vunpack.i.l.bf16 %v4086_v45  ;;  %v3626_v45 = vor.u32 %v3861_v4, %v3623_v9  ;;  %v3558_v4 = vor.u32 %v3847_v15, %v3557_v58  ;;  %v3880_v58 = vld [vmem:[#allocation17 + $0x38] sm:$0xff] }
 0x564   : > { %v4076_v63 = vpop.permute.xlu1 %4075  ;;  %v3888_v15 = vld [vmem:[#allocation17 + $0x78] sm:$0xff] }
 0x565   : > { %v4078_v49 = vunpack.i.h.bf16 %v4076_v63  ;;  %v4077_v20 = vunpack.i.l.bf16 %v4076_v63  ;;  %v3630_v63 = vor.u32 %v3864_v16, %v3629_v10  ;;  %2661 = vmatpush.bf16.msra.mxu3 %v3626_v45  ;;  %v3566_v45 = vor.u32 %v3848_v1, %v3565_v43  ;;  %v3894_v43 = vld [vmem:[#allocation17 + $0xa8] sm:$0xff] }
 0x567   : > { %v2297_v28 = vsel %vm1650_vm8, %v5379_v39, %v4077_v20  ;;  %v2298_v0 = vsel %vm1650_vm8, %v2266_v55, %v4078_v49  ;;  %v4170_v39 = vld [vmem:[%s4814_s18 + $0x8] sm:$0xff]  ;;  %s3905_s18 = sshll.u32 %s4683_s20, 4  ;;  %s3194_s20 = scalar_lea.sflag [#allocation4], %s4808_s24 }
 0x568   : > { %v2300_v30 = vsel %vm2299_vm11, %v2297_v28, %v4082_v24  ;;  %v2301_v33 = vsel %vm2299_vm11, %v2298_v0, %v4083_v22  ;;  %v3645_v55 = vld [vmem:[#allocation16 + $0xc8] sm:$0xf]  ;;  %v3862_v49 = vld [vmem:[#allocation16 + $0xac] sm:$0xf]  ;;  %v3631_v20 = vld [vmem:[#allocation16 + $0xb8] sm:$0xf0]  ;;  %s3205_s6 = scalar_lea.hbm %s5711_s26, %s3905_s18 }
 0x569   : > { %v2303_v5 = vsel %vm2302_vm12, %v2300_v30, %v4087_v57  ;;  %v2304_v17 = vsel %vm2302_vm12, %v2301_v33, %v4088_v61  ;;  %v3646_v27 = vor.u32 %v3868_v3, %v3645_v55  ;;  %v3634_v22 = vor.u32 %v3862_v49, %v3631_v20  ;;  %v3605_v24 = vld [vmem:[#allocation16 + $0x80] sm:$0xf]  ;;  %v3859_v61 = vld [vmem:[#allocation16 + $0x8c] sm:$0xf0]  ;;  %v3857_v57 = vld [vmem:[#allocation16 + $0x84] sm:$0xf] }
 0x56a   : > { %v2305_v50 = vpack.c.bf16 %v2304_v17, %v2303_v5  ;;  %v3606_v0 = vor.u32 %v3859_v61, %v3605_v24  ;;  %v3607_v30 = vld [vmem:[#allocation16 + $0x90] sm:$0xf0]  ;;  %v3613_v33 = vld [vmem:[#allocation16 + $0x88] sm:$0xf]  ;;  %v3860_v5 = vld [vmem:[#allocation16 + $0x94] sm:$0xf0]  ;;  %v3586_v3 = vor.u32 %v3850_v52, %v3583_v54 }
 0x56b   : > { %2674 = vmatpush.bf16.msrb.mxu0 %v3646_v27  ;;  %2689 = vmatpush.bf16.msra.mxu1 %v3634_v22  ;;  %v3559_v27 = vld [vmem:[#allocation16 + $0x30] sm:$0xf0]  ;;  %v3841_v49 = vld [vmem:[#allocation16 + $0x4] sm:$0xf]  ;;  %v3570_v22 = vor.u32 %v3846_v29, %v3567_v59  ;;  %v3844_v61 = vld [vmem:[#allocation16 + $0x14] sm:$0xf0] }
 0x56c   : > { %2382 = vmatmul.bf16.vlgmr.msrb.gmra.mxu1 %v2305_v50  ;;  %v3610_v50 = vor.u32 %v3857_v57, %v3607_v30  ;;  %2648 = vmatpush.bf16.msrb.mxu2 %v3606_v0  ;;  %v3562_v16 = vor.u32 %v3845_v14, %v3559_v27  ;;  %v3543_v24 = vld [vmem:[#allocation16 + $0x10] sm:$0xf0]  ;;  %v3842_v57 = vld [vmem:[#allocation16 + $0xc] sm:$0xf]  ;;  %s3208_s28 = sshll.u32 %s3205_s6, 4  ;;  %s3209_s28 = int_to_ptr.hbm [resolvable:$true] %s3208_s28 }
 0x56d   : > { %s4485_s4 = sshra.s32 %s3209_s28, 4  ;;  %s4486_s4 = int_to_ptr.hbm [resolvable:$true] %s4485_s4 }
 0x56e   : > { %2662 = vmatpush.bf16.msra.mxu3 %v3610_v50  ;;  %s4487_s23 = scalar_lea.hbm %s4486_s4, 16  ;;  %p4492_p13 = scmp.lt.s32.totalorder %s4486_s4, %s5711_s26 }
 0x56f   : > { %2675 = vmatpush.bf16.msrb.mxu0 %v3630_v63  ;;  %v3843_v63 = vld [vmem:[#allocation16 + $0xc] sm:$0xf0]  ;;  %p4488_p1 = scmp.ne.s32.totalorder %s4486_s4, %s4487_s23  ;;  %p4493_p7 = scmp.lt.s32.totalorder %s4491_s1, %s4487_s23 }
 0x570   : > { %v3542_v30 = vor.u32 %v3843_v63, %v3541_v6  ;;  %v3879_v6 = vld [vmem:[#allocation17 + $0x30] sm:$0xff]  ;;  %v3901_v63 = vld [vmem:[#allocation17 + $0xe0] sm:$0xff] }
 0x571   : > { %p4489_p3 = pnand %p4488_p1, %p4775_p0  ;;  %p4494_p8 = por %p4493_p7, %p4492_p13 }
 0x573   : > { %p4490_p4 = pneg %p4489_p3 }
 0x575   : > { %p4495_p9 = pnand %p4494_p8, %p4490_p4 }
 0x5e9   : > { %v2383_v34 = vpop.f32.mrf.mxu1 }
 0x5ea   : > { %v2384_v35 = vadd.f32 %v4091_v25, %v2383_v34  ;;  %v3858_v34 = vld [vmem:[#allocation16 + $0x8c] sm:$0xf] }
 0x5ec   : > { %v5405_v12 = vadd.f32 %v4169_v62, %v2384_v35  ;;  %v3615_v35 = vld [vmem:[#allocation16 + $0x98] sm:$0xf0]  ;;  %v3589_v62 = vld [vmem:[#allocation16 + $0x60] sm:$0xf] }
 0x5ee   : > { %2392 = vadd.xlane.f32.xlu1 %v5405_v12 }
 0x5f1   : > { %v2385_v36 = vpop.f32.mrf.mxu1 }
 0x5f2   : > { %v2386_v37 = vadd.f32 %v4091_v25, %v2385_v36  ;;  %v3614_v25 = vor.u32 %v3860_v5, %v3613_v33  ;;  %v3618_v36 = vor.u32 %v3858_v34, %v3615_v35  ;;  %v3546_v33 = vor.u32 %v3841_v49, %v3543_v24 }
 0x5f4   : > { %v5409_v7 = vadd.f32 %v4170_v39, %v2386_v37  ;;  %v3855_v37 = vld [vmem:[#allocation16 + $0x6c] sm:$0xf0]  ;;  %v3853_v39 = vld [vmem:[#allocation16 + $0x64] sm:$0xf]  ;;  %2676 = vmatpush.bf16.msrb.mxu0 %v3614_v25  ;;  %2690 = vmatpush.bf16.msra.mxu1 %v3618_v36 }
 0x5f6   : > { %2394 = vadd.xlane.f32.xlu0 %v5409_v7 }
 0x5f8   : > { %2691 = vmatpush.bf16.msra.mxu1 %v3602_v31 }
 0x5fc   : > { %2692 = vmatpush.bf16.msra.mxu1 %v3586_v3 }
 0x600   : > { %2693 = vmatpush.bf16.msra.mxu1 %v3570_v22 }
 0x661   : > { %v2393_v60 = vpop.xlane.xlu1 %2392 }
 0x662   : > { %v2396_v56 = vmul.f32 %v2393_v60, %v4842_v8  ;;  %v3591_v60 = vld [vmem:[#allocation16 + $0x70] sm:$0xf0] }
 0x664   : > { %v5414_v21 = vsub.f32 %v5405_v12, %v2396_v56 }
 0x666   : > { %v2400_v18 = vmul.f32 %v5414_v21, %v5414_v21 }
 0x668   : > { %2402 = vadd.xlane.f32.xlu2 %v2400_v18  ;;  %v3590_v18 = vor.u32 %v3855_v37, %v3589_v62 }
 0x669   : > { %v2395_v23 = vpop.xlane.xlu0 %2394 }
 0x66a   : > { %v2397_v40 = vmul.f32 %v2395_v23, %v4842_v8  ;;  %v3594_v23 = vor.u32 %v3853_v39, %v3591_v60  ;;  %2649 = vmatpush.bf16.msrb.mxu2 %v3590_v18 }
 0x66c   : > { %v5420_v19 = vsub.f32 %v5409_v7, %v2397_v40  ;;  %v3597_v40 = vld [vmem:[#allocation16 + $0x68] sm:$0xf]  ;;  %2663 = vmatpush.bf16.msra.mxu3 %v3594_v23  ;;  %v4092_v23 = vld [vmem:[#allocation14] ss:$0 sm:$0xff] }
 0x66e   : > { %v2401_v41 = vmul.f32 %v5420_v19, %v5420_v19  ;;  %2650 = vmatpush.bf16.msrb.mxu2 %v3574_v42 }
 0x670   : > { %2404 = vadd.xlane.f32.xlu1 %v2401_v41  ;;  %v3856_v41 = vld [vmem:[#allocation16 + $0x74] sm:$0xf0]  ;;  %2664 = vmatpush.bf16.msra.mxu3 %v3578_v53 }
 0x671   : > { %v3598_v44 = vor.u32 %v3856_v41, %v3597_v40 }
 0x672   : > { %2651 = vmatpush.bf16.msrb.mxu2 %v3558_v4 }
 0x673   : > { %2677 = vmatpush.bf16.msrb.mxu0 %v3598_v44 }
 0x674   : > { %2665 = vmatpush.bf16.msra.mxu3 %v3562_v16 }
 0x676   : > { %2652 = vmatpush.bf16.msrb.mxu2 %v3542_v30 }
 0x677   : > { %2678 = vmatpush.bf16.msrb.mxu0 %v3582_v38 }
 0x678   : > { %2666 = vmatpush.bf16.msra.mxu3 %v3546_v33 }
 0x67a   : > { %3133 = vmatpush.bf16.msra.mxu2 %v3880_v58 }
 0x67b   : > { %2679 = vmatpush.bf16.msrb.mxu0 %v3566_v45  ;;  %v3893_v45 = vld [vmem:[#allocation17 + $0xa0] sm:$0xff] }
 0x67c   : > { %3147 = vmatpush.bf16.msrb.mxu3 %v3888_v15 }
 0x67e   : > { %3134 = vmatpush.bf16.msra.mxu2 %v3879_v6 }
 0x6db   : > { %v2403_v28 = vpop.xlane.xlu2 %2402 }
 0x6dc   : > { %v2406_v17 = vmul.f32 %v2403_v28, %v4842_v8  ;;  %v3551_v28 = vld [vmem:[#allocation16 + $0x18] sm:$0xf0] }
 0x6dd   : > { %v3554_v50 = vor.u32 %v3842_v57, %v3551_v28  ;;  %v3878_v57 = vld [vmem:[#allocation17 + $0x28] sm:$0xff] }
 0x6de   : > { %v5425_v56 = vadd.f32 1e-05, %v2406_v17  ;;  %v3886_v28 = vld [vmem:[#allocation17 + $0x68] sm:$0xff]  ;;  %3135 = vmatpush.bf16.msra.mxu2 %v3878_v57 }
 0x6df   : > { %2694 = vmatpush.bf16.msra.mxu1 %v3554_v50  ;;  %v3900_v50 = vld [vmem:[#allocation17 + $0xd8] sm:$0xff] }
 0x6e0   : > { %4133 = vrsqrt.f32 %v5425_v56  ;;  %vm2416_vm14 = vweird.f32 %v5425_v56 }
 0x6e3   : > { %v2405_v55 = vpop.xlane.xlu1 %2404 }
 0x6e4   : > { %v2407_v26 = vmul.f32 %v2405_v55, %v4842_v8  ;;  %v3549_v8 = vld [vmem:[#allocation16 + $0x8] sm:$0xf] }
 0x6e5   : > { %v3550_v5 = vor.u32 %v3844_v61, %v3549_v8 }
 0x6e6   : > { %v4134_v9 = vpop.eup %4133  ;;  %v2409_v10 = vadd.f32 1e-05, %v2407_v26  ;;  %v3902_v26 = vld [vmem:[#allocation17 + $0xe8] sm:$0xff] }
 0x6e7   : > { %v2411_v20 = vmul.f32 %v4134_v9, %v5425_v56  ;;  %2680 = vmatpush.bf16.msrb.mxu0 %v3550_v5  ;;  %vm2417_vm13 = vweird.f32 %v4134_v9  ;;  %v4093_v56 = vld [vmem:[%s5664_s9] ss:$0 sm:$0xff] }
 0x6e8   : > { %4135 = vrsqrt.f32 %v2409_v10  ;;  %vm2418_vm15 = vmor %vm2416_vm14, %vm2417_vm13  ;;  %vm2426_vm1 = vweird.f32 %v2409_v10 }
 0x6e9   : > { %v2412_v0 = vmul.f32 %v4134_v9, %v2411_v20 }
 0x6eb   : > { %v2413_v17 = vmul.f32 0.5, %v2412_v0  ;;  %3161 = vmatpush.bf16.msra.mxu0 %v3896_v48 }
 0x6ed   : > { %v2414_v25 = vsub.f32 1.5, %v2413_v17  ;;  %v3892_v17 = vld [vmem:[#allocation17 + $0x98] sm:$0xff] }
 0x6ee   : > { %v4136_v34 = vpop.eup %4135 }
 0x6ef   : > { %v2415_v35 = vmul.f32 %v4134_v9, %v2414_v25  ;;  %v2421_v62 = vmul.f32 %v4136_v34, %v2409_v10  ;;  %vm2427_vm0 = vweird.f32 %v4136_v34  ;;  %3162 = vmatpush.bf16.msra.mxu0 %v3895_v46  ;;  %v3883_v46 = vld [vmem:[#allocation17 + $0x50] sm:$0xff] }
 0x6f0   : > { %vm2428_vm2 = vmor %vm2426_vm1, %vm2427_vm0 }
 0x6f1   : > { %v2422_v36 = vmul.f32 %v4136_v34, %v2421_v62  ;;  %v2419_v37 = vsel %vm2418_vm15, %v4134_v9, %v2415_v35  ;;  %v3887_v9 = vld [vmem:[#allocation17 + $0x70] sm:$0xff]  ;;  %v3877_v62 = vld [vmem:[#allocation17 + $0x20] sm:$0xff] }
 0x6f2   : > { %v2430_v18 = vmul.f32 %v2419_v37, %v5414_v21  ;;  %v5439_v21 = vld [vmem:[%s5695_s27] sm:$0xf]  ;;  %3148 = vmatpush.bf16.msrb.mxu3 %v3887_v9  ;;  %3136 = vmatpush.bf16.msra.mxu2 %v3877_v62 }
 0x6f3   : > { %v2423_v39 = vmul.f32 0.5, %v2422_v36  ;;  %v2479_v13 = vperm.slane %v5439_v21, 2  ;;  %v2480_v42 = vperm.slane %v5439_v21, 3  ;;  %v2477_v55 = vperm.slane %v5439_v21, 0  ;;  %3163 = vmatpush.bf16.msra.mxu0 %v3894_v43  ;;  %v3885_v36 = vld [vmem:[#allocation17 + $0x60] sm:$0xff] }
 0x6f4   : > { %v2435_v32 = vmul.f32 %v4092_v23, %v2430_v18  ;;  %v2478_v3 = vperm.slane %v5439_v21, 1 }
 0x6f5   : > { %v2424_v60 = vsub.f32 1.5, %v2423_v39 }
 0x6f6   : > { %v2440_v2 = vadd.f32 %v4093_v56, %v2435_v32  ;;  %3149 = vmatpush.bf16.msrb.mxu3 %v3886_v28  ;;  %v3884_v32 = vld [vmem:[#allocation17 + $0x58] sm:$0xff] }
 0x6f7   : > { %v2425_v40 = vmul.f32 %v4136_v34, %v2424_v60  ;;  %3164 = vmatpush.bf16.msra.mxu0 %v3893_v45 }
 0x6f9   : > { %v2429_v41 = vsel %vm2428_vm2, %v4136_v34, %v2425_v40  ;;  %v3891_v40 = vld [vmem:[#allocation17 + $0x90] sm:$0xff] }
 0x6fa   : > { %v2431_v44 = vmul.f32 %v2429_v41, %v5420_v19  ;;  %v3904_v19 = vld [vmem:[#allocation17 + $0xf8] sm:$0xff]  ;;  %3150 = vmatpush.bf16.msrb.mxu3 %v3885_v36  ;;  %v3899_v41 = vld [vmem:[#allocation17 + $0xd0] sm:$0xff] }
 0x6fb   : > { %3175 = vmatpush.bf16.msrb.mxu1 %v3904_v19  ;;  %3165 = vmatpush.bf16.msra.mxu0 %v3892_v17  ;;  %v3898_v19 = vld [vmem:[#allocation17 + $0xc8] sm:$0xff] }
 0x6fc   : > { %v2436_v11 = vmul.f32 %v4092_v23, %v2431_v44  ;;  %v3876_v44 = vld [vmem:[#allocation17 + $0x18] sm:$0xff] }
 0x6fd   : > { %3137 = vmatpush.bf16.msra.mxu2 %v3876_v44 }
 0x6fe   : > { %v2441_v31 = vadd.f32 %v4093_v56, %v2436_v11  ;;  %3151 = vmatpush.bf16.msrb.mxu3 %v3884_v32 }
 0x6ff   : > { %3176 = vmatpush.bf16.msrb.mxu1 %v3903_v51  ;;  %3166 = vmatpush.bf16.msra.mxu0 %v3891_v40 }
 0x700   : > { %v2442_v47 = vpack.c.bf16 %v2441_v31, %v2440_v2  ;;  %v3890_v31 = vld [vmem:[#allocation17 + $0x88] sm:$0xff] }
 0x702   : > { %2653 = vmatmul.bf16.vlgmr.msrb.gmra.mxu2 %v2442_v47  ;;  %2667 = vmatmul.bf16.vlgmr.msra.gmra.mxu3 %v2442_v47 }
 0x703   : > { %2681 = vmatmul.bf16.vlgmr.msrb.gmra.mxu0 %v2442_v47  ;;  %2695 = vmatmul.bf16.vlgmr.msra.gmra.mxu1 %v2442_v47 }
 0x704   : > { %3177 = vmatpush.bf16.msrb.mxu1 %v3902_v26  ;;  %3167 = vmatpush.bf16.msra.mxu0 %v3890_v31 }
 0x705   : > { %3152 = vmatpush.bf16.msrb.mxu3 %v3883_v46 }
 0x708   : > { %3178 = vmatpush.bf16.msrb.mxu1 %v3901_v63 }
 0x70c   : > { %3179 = vmatpush.bf16.msrb.mxu1 %v3900_v50 }
 0x710   : > { %3180 = vmatpush.bf16.msrb.mxu1 %v3899_v41 }
 0x714   : > { %3181 = vmatpush.bf16.msrb.mxu1 %v3898_v19 }
 0x780   : > { %v2682_v52 = vpop.f32.mrf.mxu0  ;;  %v2696_v53 = vpop.f32.mrf.mxu1 }
 0x781   : > { %v5443_v38 = vadd.f32 %v2682_v52, %v2479_v13  ;;  %v5445_v54 = vadd.f32 %v2696_v53, %v2480_v42 }
 0x783   : > { %v3669_v14 = vmul.f32 -1.702, %v5443_v38  ;;  %v3670_v27 = vmul.f32 -1.702, %v5445_v54 }
 0x785   : > { %v2721_v1 = vmul.f32 1.442695, %v3669_v14  ;;  %v2723_v29 = vmul.f32 1.442695, %v3670_v27  ;;  %v2654_v59 = vpop.f32.mrf.mxu2  ;;  %v2668_v4 = vpop.f32.mrf.mxu3  ;;  %v3897_v14 = vld [vmem:[#allocation17 + $0xc0] sm:$0xff] }
 0x786   : > { %v5451_v10 = vadd.f32 %v2654_v59, %v2477_v55  ;;  %v5455_v16 = vadd.f32 %v2668_v4, %v2478_v3  ;;  %v3874_v59 = vld [vmem:[#allocation17 + $0x8] sm:$0xff]  ;;  %3182 = vmatpush.bf16.msrb.mxu1 %v3897_v14 }
 0x787   : > { %4137 = vpow2.f32 %v2721_v1  ;;  %v3882_v4 = vld [vmem:[#allocation17 + $0x48] sm:$0xff] }
 0x788   : > { %4139 = vpow2.f32 %v2723_v29  ;;  %v3667_v49 = vmul.f32 -1.702, %v5451_v10  ;;  %v3668_v20 = vmul.f32 -1.702, %v5455_v16  ;;  %v2684_v22 = vpop.f32.mrf.mxu0  ;;  %v2698_v24 = vpop.f32.mrf.mxu1  ;;  %3153 = vmatpush.bf16.msrb.mxu3 %v3882_v4 }
 0x789   : > { %v5459_v8 = vadd.f32 %v2684_v22, %v2479_v13  ;;  %v5461_v61 = vadd.f32 %v2698_v24, %v2480_v42  ;;  %v3875_v42 = vld [vmem:[#allocation17 + $0x10] sm:$0xff] }
 0x78a   : > { %v2717_v0 = vmul.f32 1.442695, %v3667_v49  ;;  %v2719_v30 = vmul.f32 1.442695, %v3668_v20  ;;  %3138 = vmatpush.bf16.msra.mxu2 %v3875_v42  ;;  %v3873_v49 = vld [vmem:[#allocation17] sm:$0xff] }
 0x78b   : > { %v3673_v33 = vmul.f32 -1.702, %v5459_v8  ;;  %v3674_v5 = vmul.f32 -1.702, %v5461_v61  ;;  %v3881_v20 = vld [vmem:[#allocation17 + $0x40] sm:$0xff] }
 0x78c   : > { %4141 = vpow2.f32 %v2717_v0  ;;  %3154 = vmatpush.bf16.msrb.mxu3 %v3881_v20 }
 0x78d   : > { %v4138_v25 = vpop.eup %4137  ;;  %v2729_v34 = vmul.f32 1.442695, %v3673_v33  ;;  %v2656_v35 = vpop.f32.mrf.mxu2  ;;  %4143 = vpow2.f32 %v2719_v30  ;;  %v2731_v60 = vmul.f32 1.442695, %v3674_v5 }
 0x78e   : > { %v4140_v37 = vpop.eup %4139  ;;  %v5465_v39 = vadd.f32 1.0, %v4138_v25  ;;  %v5467_v18 = vadd.f32 %v2656_v35, %v2477_v55  ;;  %v2670_v48 = vpop.f32.mrf.mxu3  ;;  %v3889_v55 = vld [vmem:[#allocation17 + $0x80] sm:$0xff]  ;;  %3139 = vmatpush.bf16.msra.mxu2 %v3874_v59 }
 0x78f   : > { %v5469_v23 = vadd.f32 1.0, %v4140_v37  ;;  %4145 = vpow2.f32 %v2729_v34  ;;  %v5485_v15 = vadd.f32 %v2670_v48, %v2478_v3  ;;  %3168 = vmatpush.bf16.msra.mxu0 %v3889_v55 }
 0x790   : > { %4147 = vrcp.f32 %v5465_v39  ;;  %v3671_v11 = vmul.f32 -1.702, %v5467_v18  ;;  %v2780_v63 = vand.u32 2147483647, %v5465_v39  ;;  %v2782_v22 = vand.u32 2147483648, %v5465_v39 }
 0x791   : > { %4149 = vrcp.f32 %v5469_v23  ;;  %v3672_v21 = vmul.f32 -1.702, %v5485_v15  ;;  %v2795_v24 = vand.u32 2147483647, %v5469_v23  ;;  %v2797_v57 = vand.u32 2147483648, %v5469_v23 }
 0x792   : > { %v4142_v56 = vpop.eup %4141  ;;  %4151 = vpow2.f32 %v2731_v60  ;;  %v2725_v52 = vmul.f32 1.442695, %v3671_v11  ;;  %3140 = vmatpush.bf16.msra.mxu2 %v3873_v49  ;;  %vm2776_vm4 = vweird.f32 %v5465_v39  ;;  %vm5512_vm5 = vcmp.eq.f32.partialorder %v2780_v63, 8.507059e+37 }
 0x793   : > { %v5474_v2 = vadd.f32 1.0, %v4142_v56  ;;  %v4144_v47 = vpop.eup %4143  ;;  %v2727_v28 = vmul.f32 1.442695, %v3672_v21  ;;  %vm2791_vm6 = vweird.f32 %v5469_v23  ;;  %v2783_v25 = vor.u32 1.1754944e-38, %v2782_v22 }
 0x794   : > { %v5489_v1 = vadd.f32 1.0, %v4144_v47  ;;  %vm5517_vm7 = vcmp.eq.f32.partialorder %v2795_v24, 8.507059e+37  ;;  %v2798_v35 = vor.u32 1.1754944e-38, %v2797_v57 }
 0x795   : > { %v4146_v13 = vpop.eup %4145  ;;  %4153 = vrcp.f32 %v5474_v2  ;;  %v2752_v11 = vand.u32 2147483648, %v5474_v2  ;;  %v2750_v24 = vand.u32 2147483647, %v5474_v2 }
 0x796   : > { %v5476_v51 = vpop.eup %4147  ;;  %v5491_v29 = vadd.f32 1.0, %v4146_v13  ;;  %4155 = vpow2.f32 %v2725_v52 }
 0x797   : > { %v5478_v53 = vpop.eup %4149  ;;  %v2772_v58 = vmul.f32 %v5476_v51, %v5465_v39  ;;  %vm2777_vm3 = vweird.f32 %v5476_v51 }
 0x798   : > { %v4152_v27 = vpop.eup %4151  ;;  %v2787_v43 = vmul.f32 %v5478_v53, %v5469_v23  ;;  %4157 = vrcp.f32 %v5491_v29  ;;  %vm5524_vm8 = vmor %vm2776_vm4, %vm2777_vm3  ;;  %vm2792_vm9 = vweird.f32 %v5478_v53  ;;  %v2840_v39 = vand.u32 2147483647, %v5491_v29 }
 0x799   : > { %v2773_v26 = vsub.f32 1.0, %v2772_v58  ;;  %v5493_v6 = vadd.f32 1.0, %v4152_v27  ;;  %4159 = vrcp.f32 %v5489_v1  ;;  %vm2836_vm10 = vweird.f32 %v5491_v29  ;;  %vm5549_vm12 = vmor %vm2791_vm6, %vm2792_vm9 }
 0x79a   : > { %v2788_v9 = vsub.f32 1.0, %v2787_v43  ;;  %v2842_v31 = vand.u32 2147483648, %v5491_v29  ;;  %vm5554_vm14 = vcmp.eq.f32.partialorder %v2840_v39, 8.507059e+37  ;;  %vm2746_vm3 = vweird.f32 %v5474_v2 }
 0x79b   : > { %v2774_v3 = vmul.f32 %v5476_v51, %v2773_v26  ;;  %v5498_v45 = vpop.eup %4153  ;;  %4161 = vrcp.f32 %v5493_v6  ;;  %v2857_v23 = vand.u32 2147483648, %v5493_v6  ;;  %v2855_v26 = vand.u32 2147483647, %v5493_v6 }
 0x79c   : > { %v4156_v0 = vpop.eup %4155  ;;  %v2789_v33 = vmul.f32 %v5478_v53, %v2788_v9  ;;  %v2742_v5 = vmul.f32 %v5498_v45, %v5474_v2  ;;  %4163 = vpow2.f32 %v2727_v28  ;;  %vm2747_vm13 = vweird.f32 %v5498_v45 }
 0x79d   : > { %v2775_v30 = vadd.f32 %v5476_v51, %v2774_v3  ;;  %v5530_v60 = vadd.f32 1.0, %v4156_v0  ;;  %v2843_v27 = vor.u32 1.1754944e-38, %v2842_v31  ;;  %vm2851_vm1 = vweird.f32 %v5493_v6 }
 0x79e   : > { %v4158_v17 = vpop.eup %4157  ;;  %v2790_v44 = vadd.f32 %v5478_v53, %v2789_v33  ;;  %v2743_v32 = vsub.f32 1.0, %v2742_v5  ;;  %v2858_v22 = vor.u32 1.1754944e-38, %v2857_v23  ;;  %vm2856_vm4 = vcmp.eq.f32.partialorder %v2855_v26, 8.507059e+37  ;;  %v4094_v23 = vld [vmem:[%s5710_s7] ss:$0 sm:$0xff] }
 0x79f   : > { %v2832_v62 = vmul.f32 %v4158_v17, %v5491_v29  ;;  %v5522_v36 = vpop.eup %4159  ;;  %v2779_v41 = vsel %vm5524_vm8, %v5476_v51, %v2775_v30  ;;  %vm2837_vm11 = vweird.f32 %v4158_v17  ;;  %4165 = vrcp.f32 %v5530_v60 }
 0x7a0   : > { %v2757_v48 = vmul.f32 %v5522_v36, %v5489_v1  ;;  %v2784_v13 = vsel %vm5512_vm5, %v2783_v25, %v2779_v41  ;;  %v2794_v52 = vsel %vm5549_vm12, %v5478_v53, %v2790_v44  ;;  %v2744_v58 = vmul.f32 %v5498_v45, %v2743_v32  ;;  %vm2838_vm15 = vmor %vm2836_vm10, %vm2837_vm11 }
 0x7a1   : > { %v4162_v40 = vpop.eup %4161  ;;  %v2833_v56 = vsub.f32 1.0, %v2832_v62  ;;  %v2863_v53 = vmul.f32 %v2784_v13, %v5443_v38  ;;  %v2799_v3 = vsel %vm5517_vm7, %v2798_v35, %v2794_v52  ;;  %vm5584_vm5 = vmor %vm2746_vm3, %vm2747_vm13  ;;  %v2753_v2 = vor.u32 1.1754944e-38, %v2752_v11 }
 0x7a2   : > { %v2847_v47 = vmul.f32 %v4162_v40, %v5493_v6  ;;  %v4164_v14 = vpop.eup %4163  ;;  %vm2852_vm0 = vweird.f32 %v4162_v40  ;;  %v2758_v59 = vsub.f32 1.0, %v2757_v48  ;;  %v2745_v49 = vadd.f32 %v5498_v45, %v2744_v58 }
 0x7a3   : > { %v2834_v19 = vmul.f32 %v4158_v17, %v2833_v56  ;;  %v5567_v21 = vadd.f32 1.0, %v4164_v14  ;;  %vm2853_vm2 = vmor %vm2851_vm1, %vm2852_vm0  ;;  %v2864_v30 = vmul.f32 %v2799_v3, %v5445_v54  ;;  %v2812_v50 = vand.u32 2147483648, %v5530_v60 }
 0x7a4   : > { %v2848_v51 = vsub.f32 1.0, %v2847_v47  ;;  %v2759_v57 = vmul.f32 %v5522_v36, %v2758_v59  ;;  %v2810_v54 = vand.u32 2147483647, %v5530_v60  ;;  %vm2751_vm7 = vcmp.eq.f32.partialorder %v2750_v24, 8.507059e+37 }
 0x7a5   : > { %v2835_v55 = vadd.f32 %v4158_v17, %v2834_v19  ;;  %v4166_v63 = vpop.eup %4165  ;;  %4167 = vrcp.f32 %v5567_v21  ;;  %vm2762_vm8 = vweird.f32 %v5522_v36  ;;  %vm2806_vm9 = vweird.f32 %v5530_v60 }
 0x7a6   : > { %v2849_v43 = vmul.f32 %v4162_v40, %v2848_v51  ;;  %v2802_v38 = vmul.f32 %v4166_v63, %v5530_v60  ;;  %vm2807_vm6 = vweird.f32 %v4166_v63  ;;  %v2760_v62 = vadd.f32 %v5522_v36, %v2759_v57 }
 0x7a7   : > { %v2839_v4 = vsel %vm2838_vm15, %v4158_v17, %v2835_v55  ;;  %v2749_v17 = vsel %vm5584_vm5, %v5498_v45, %v2745_v49  ;;  %vm2761_vm10 = vweird.f32 %v5489_v1  ;;  %v2767_v39 = vand.u32 2147483648, %v5489_v1  ;;  %vm2808_vm11 = vmor %vm2806_vm9, %vm2807_vm6 }
 0x7a8   : > { %v2844_v29 = vsel %vm5554_vm14, %v2843_v27, %v2839_v4  ;;  %v2850_v9 = vadd.f32 %v4162_v40, %v2849_v43  ;;  %v2803_v5 = vsub.f32 1.0, %v2802_v38  ;;  %vm5600_vm12 = vmor %vm2761_vm10, %vm2762_vm8  ;;  %v2765_v44 = vand.u32 2147483647, %v5489_v1 }
 0x7a9   : > { %v2867_v20 = vmul.f32 %v2844_v29, %v5459_v8  ;;  %vm2811_vm13 = vcmp.eq.f32.partialorder %v2810_v54, 8.507059e+37  ;;  %v2764_v11 = vsel %vm5600_vm12, %v5522_v36, %v2760_v62  ;;  %v2827_v47 = vand.u32 2147483648, %v5567_v21 }
 0x7aa   : > { %v2854_v6 = vsel %vm2853_vm2, %v4162_v40, %v2850_v9  ;;  %v2804_v34 = vmul.f32 %v4166_v63, %v2803_v5  ;;  %v2813_v40 = vor.u32 1.1754944e-38, %v2812_v50  ;;  %v2825_v13 = vand.u32 2147483647, %v5567_v21 }
 0x7ab   : > { %v2871_v28 = vpack.c.bf16 %v2867_v20, %v2863_v53  ;;  %v2859_v0 = vsel %vm2856_vm4, %v2858_v22, %v2854_v6  ;;  %v4168_v35 = vpop.eup %4167  ;;  %v2768_v42 = vor.u32 1.1754944e-38, %v2767_v39  ;;  %vm2766_vm15 = vcmp.eq.f32.partialorder %v2765_v44, 8.507059e+37 }
 0x7ac   : > { %v2868_v33 = vmul.f32 %v2859_v0, %v5461_v61  ;;  %v2754_v61 = vsel %vm2751_vm7, %v2753_v2, %v2749_v17  ;;  %v2805_v37 = vadd.f32 %v4166_v63, %v2804_v34  ;;  %v2817_v45 = vmul.f32 %v4168_v35, %v5567_v21 }
 0x7ad   : > { %3169 = vmatmul.bf16.vlgmr.msra.gmra.mxu0 %v2871_v28  ;;  %v2861_v60 = vmul.f32 %v2754_v61, %v5451_v10  ;;  %vm2822_vm14 = vweird.f32 %v4168_v35  ;;  %vm2821_vm0 = vweird.f32 %v5567_v21  ;;  %v2769_v10 = vsel %vm2766_vm15, %v2768_v42, %v2764_v11 }
 0x7ae   : > { %v2872_v25 = vpack.c.bf16 %v2868_v33, %v2864_v30  ;;  %v2809_v32 = vsel %vm2808_vm11, %v4166_v63, %v2805_v37  ;;  %v2818_v56 = vsub.f32 1.0, %v2817_v45  ;;  %vm2823_vm1 = vmor %vm2821_vm0, %vm2822_vm14  ;;  %v2828_v51 = vor.u32 1.1754944e-38, %v2827_v47 }
 0x7af   : > { %v2814_v31 = vsel %vm2811_vm13, %v2813_v40, %v2809_v32  ;;  %vm2826_vm2 = vcmp.eq.f32.partialorder %v2825_v13, 8.507059e+37 }
 0x7b0   : > { %3183 = vmatmul.bf16.vlgmr.msrb.gmra.mxu1 %v2872_v25  ;;  %v2865_v48 = vmul.f32 %v2814_v31, %v5467_v18  ;;  %v2819_v19 = vmul.f32 %v4168_v35, %v2818_v56  ;;  %v2862_v18 = vmul.f32 %v2769_v10, %v5455_v16 }
 0x7b2   : > { %v2869_v1 = vpack.c.bf16 %v2865_v48, %v2861_v60  ;;  %v2820_v46 = vadd.f32 %v4168_v35, %v2819_v19 }
 0x7b4   : > { %v2824_v52 = vsel %vm2823_vm1, %v4168_v35, %v2820_v46  ;;  %3141 = vmatmul.bf16.vlgmr.msra.gmra.mxu2 %v2869_v1 }
 0x7b5   : > { %v2829_v36 = vsel %vm2826_vm2, %v2828_v51, %v2824_v52 }
 0x7b6   : > { %v2866_v58 = vmul.f32 %v2829_v36, %v5485_v15 }
 0x7b8   : > { %v2870_v55 = vpack.c.bf16 %v2866_v58, %v2862_v18 }
 0x7ba   : > { %3155 = vmatmul.bf16.vlgmr.msrb.gmra.mxu3 %v2870_v55 }
 0x82a   : > { %v3170_v43 = vpop.f32.mrf.mxu0 }
 0x82d   : > { %v3184_v4 = vpop.f32.mrf.mxu1 }
 0x832   : > { %v3172_v63 = vpop.f32.mrf.mxu0 }
 0x835   : > { %v3186_v20 = vpop.f32.mrf.mxu1 }
 0x837   : > { %v3142_v14 = vpop.f32.mrf.mxu2 }
 0x838   : > { %v3143_v27 = vadd.f32 %v4094_v23, %v3142_v14 }
 0x83d   : > { %v3156_v26 = vpop.f32.mrf.mxu3 }
 0x83e   : > { %v3157_v59 = vadd.f32 %v3156_v26, %v3143_v27 }
 0x83f   : > { %v3144_v21 = vpop.f32.mrf.mxu2 }
 0x840   : > { %v3171_v53 = vadd.f32 %v3170_v43, %v3157_v59  ;;  %v3145_v29 = vadd.f32 %v4094_v23, %v3144_v21 }
 0x842   : > { %v3185_v3 = vadd.f32 %v3184_v4, %v3171_v53 }
 0x844   : > { %v3189_v16 = vadd.f32 %v3185_v3, %v5405_v12 }
 0x845   : > { %v3158_v15 = vpop.f32.mrf.mxu3 }
 0x846   : > { %3191 = vst [vmem:[%s626_s2] sm:$0xff] %v3189_v16  ;;  %v3159_v9 = vadd.f32 %v3158_v15, %v3145_v29 }
 0x848   : > { %v3173_v49 = vadd.f32 %v3172_v63, %v3159_v9 }
 0x84a   : > { %v3187_v22 = vadd.f32 %v3186_v20, %v3173_v49 }
 0x84c   : > { %v3190_v12 = vadd.f32 %v3187_v22, %v5409_v7 }
 0x84e   : > { %3192 = vst [vmem:[%s626_s2 + $0x8] sm:$0xff] %v3190_v12 }
 0x84f   : > { %4498 = shalt.err (!%p4495_p9)
}
 0x850   : > { %s4582_s24 = smov 128   ;;  %s4583_s18 = smov 8  }
 0x851   : > { %3944 = dma.vmem_to_hbm [thread:$0]  (%p4775_p0), %s3207_s3, 256, %s3209_s28, %s3194_s20, %s4582_s24, %s4582_s24, %s4583_s18  }
 0x852 PF: > { %s3223_s2 = sand.u32 1, %s4545_s29   ;;  %p5712_p10 = scmp.ge.s32.totalorder %s4557_s16, 2 }
 0x853   : > { %s3224_s21 = scalar_lea.sflag [#allocation4], %s3223_s2 }
 0x854   : > { %p3979_p11 = pnand %p5712_p10, %p4781_p6 }
 0x856   : > { %p3980_p12 = pneg %p3979_p11 }
 0x858   : > { %4540 = dma.done.wait (%p3980_p12), %s3224_s21, 256  }
 0x859   : > { %4542 = vsyncadd (%p3980_p12), %s3224_s21, 4294967040  ;;  %p32_p2 = scmp.ge.s32.totalorder %s4751_s14, 4   ;;  %s5713_s29 = smov %s4549_s30 }
 0x85a   : > { %s5714_s30 = smov %s4553_s15  ;;  %s5715_s15 = smov %s4763_s17 }
 0x85b   : > { %s5716_s16 = smov %s4751_s14  ;;  %34 = sbr.rel (!%p32_p2) target bundleno = 20 (0x14), region = 157 }
 0x860   :  { %3230 = vsyncpa [#allocation3], 1 }
 0x861   :  { %3232 = vsyncpa [#allocation3 + $0x1], 1 }
 0x862   :  { %3233 = vsyncpa [#allocation6], 1 }
 0x863   :  { %3234 = vsyncpa [#allocation9], 1 }
 0x864   :  { %3235 = vsyncpa [#allocation12], 1 }
 0x865   :  { %3236 = vsyncpa [#allocation15], 1 }
 0x866   :  { %3237 = vsyncpa [#allocation18], 1 }
 0x867   :  { %3238 = vsyncpa [#allocation4], 1 }
 0x868   :  { %3240 = vsyncpa [#allocation4 + $0x1], 1 }

</bundles_post_ra>
